<compile_context>
chip_gen: v6e
topology: v6e:2x2x1
jax: 0.10.0
libtpu: 0.0.40
codegen_flags: <defaults>
</compile_context>

<pallas_src>
import functools

import jax
import jax.numpy as jnp
import numpy as np
from jax.experimental import pallas as pl
from jax.experimental.pallas import tpu as pltpu

# ----------------------------- model config ---------------------------------
N_FEATURE = 16                  # father-node feature dim (output is (n, 16))
IN_CHANNEL = 16 + 3             # LSTMCell input size (=19, per module __init__)
HIDDEN = N_FEATURE // 2         # LSTMCell hidden size (=8)
K_FUSED = IN_CHANNEL + HIDDEN   # fused contraction dim (=27)


def _round_up(x, m):
    return ((x + m - 1) // m) * m


# ------------------------------ Pallas kernel --------------------------------
def encoder_kernel(xh_ref, c_ref, w_ref, b_ref, out_ref):
    """One batch block, transposed layout (features on sublanes, batch on lanes).

    xh_ref : (2, K_FUSED, bn)  [x | h] stacked left(0)/right(1); f32 or bf16
    c_ref  : (2, HIDDEN,  bn)  cell states, f32
    w_ref  : (4H, K_FUSED)     fused [W_ih | W_hh], gate rows ordered [i, f, o, g]
    b_ref  : (4H, 1)           bias_ih + bias_hh, f32
    out_ref: (2H, bn)          rows 0:H = h_l + h_r, rows H:2H = c_l + c_r
    """
    H = HIDDEN
    w = w_ref[...]
    b = b_ref[...]
    prec = (jax.lax.Precision.HIGHEST if w.dtype == jnp.float32
            else jax.lax.Precision.DEFAULT)

    h_sum = None
    c_sum = None
    for s in (0, 1):  # static unroll over left/right; leading-axis index is free
        gates = jnp.dot(w, xh_ref[s], preferred_element_type=jnp.float32,
                        precision=prec) + b                      # (4H, bn) f32
        sig = jax.nn.sigmoid(gates[:3 * H])                      # [i; f; o] one push
        g_g = jnp.tanh(gates[3 * H:])                            # g, one push
        i_g = sig[0 * H:1 * H]                                   # 8-aligned sublane
        f_g = sig[1 * H:2 * H]                                   # slices -> free
        o_g = sig[2 * H:3 * H]
        c_new = f_g * c_ref[s] + i_g * g_g
        h_new = o_g * jnp.tanh(c_new)
        h_sum = h_new if h_sum is None else h_sum + h_new
        c_sum = c_new if c_sum is None else c_sum + c_new

    out_ref[:H, :] = h_sum                                        # aligned, lane-dense
    out_ref[H:, :] = c_sum


# --------------------------- parameter packing --------------------------------
def pack_params(params):
    """One-time host-side prep.

    Gate reorder [i, f, g, o] -> [i, f, o, g], fuse W_ih / W_hh along K, fold the
    two biases into a single (4H, 1) column.  No transposes or slices are left in
    the per-call path.
    """
    H = HIDDEN
    perm = np.concatenate([np.arange(0, H),          # i
                           np.arange(H, 2 * H),      # f
                           np.arange(3 * H, 4 * H),  # o
                           np.arange(2 * H, 3 * H)]) # g
    w_ih = params["weight_ih"][perm]                         # (4H, IN_CHANNEL)
    w_hh = params["weight_hh"][perm]                         # (4H, H)
    w_fused = jnp.concatenate([w_ih, w_hh], axis=1).astype(jnp.float32)  # (4H, 27)
    bias = (params["bias_ih"] + params["bias_hh"])[perm]
    bias = bias.reshape(4 * H, 1).astype(jnp.float32)        # (4H, 1)
    return w_fused, bias


# ------------------------------ wrapper --------------------------------------
@functools.partial(jax.jit, static_argnames=("block_n", "gemm_dtype"))
def encoder_forward(x_left, x_right, feat_left, feat_right, w_fused, bias,
                    *, block_n=512, gemm_dtype=jnp.float32):
    """Pallas-backed Encoder.forward over a whole tree level of node pairs.

    x_left/x_right:       (n, IN_CHANNEL) float32
    feat_left/feat_right: (n, N_FEATURE)  float32
    w_fused, bias:        from pack_params (one-time)
    returns:              (n, N_FEATURE)  float32
    """
    n = x_left.shape[0]
    H = HIDDEN

    # Batch padded to a lane-aligned multiple of the block size.
    n_pad = _round_up(max(n, 1), 128)
    bn = min(block_n, n_pad)
    n_pad = _round_up(n_pad, bn)

    # Wrapper-side (XLA) stacking / concat / transpose: batch -> lanes.
    xh = jnp.stack([jnp.concatenate([x_left, feat_left[:, :H]], axis=1),
                    jnp.concatenate([x_right, feat_right[:, :H]], axis=1)])   # (2, n, K)
    c = jnp.stack([feat_left[:, H:], feat_right[:, H:]])                      # (2, n, H)
    xh_t = jnp.transpose(xh, (0, 2, 1)).astype(gemm_dtype)                    # (2, K, n)
    c_t = jnp.transpose(c, (0, 2, 1)).astype(jnp.float32)                     # (2, H, n)

    pad = n_pad - n
    if pad:
        xh_t = jnp.pad(xh_t, ((0, 0), (0, 0), (0, pad)))
        c_t = jnp.pad(c_t, ((0, 0), (0, 0), (0, pad)))

    grid = (n_pad // bn,)
    out_t = pl.pallas_call(
        encoder_kernel,
        out_shape=jax.ShapeDtypeStruct((N_FEATURE, n_pad), jnp.float32),
        grid=grid,
        in_specs=[
            pl.BlockSpec((2, K_FUSED, bn), lambda i: (0, 0, i)),
            pl.BlockSpec((2, HIDDEN, bn), lambda i: (0, 0, i)),
            pl.BlockSpec((4 * HIDDEN, K_FUSED), lambda i: (0, 0)),   # resident weight
            pl.BlockSpec((4 * HIDDEN, 1), lambda i: (0, 0)),         # resident bias
        ],
        out_specs=pl.BlockSpec((N_FEATURE, bn), lambda i: (0, i)),
        compiler_params=pltpu.CompilerParams(
            dimension_semantics=("parallel",)),                      # 2 TCs on v7x
    )(xh_t, c_t, w_fused.astype(gemm_dtype), bias)

    return jnp.transpose(out_t[:, :n])                               # (n, 2H)


# ------------------------ pure-JAX reference (for checking) ------------------
def encoder_reference(x_left, x_right, feat_left, feat_right, params):
    H = HIDDEN

    def lstm_cell(x, h, c):
        gates = (x @ params["weight_ih"].T + params["bias_ih"]
                 + h @ params["weight_hh"].T + params["bias_hh"])
        i_g = jax.nn.sigmoid(gates[:, 0 * H:1 * H])
        f_g = jax.nn.sigmoid(gates[:, 1 * H:2 * H])
        g_g = jnp.tanh(gates[:, 2 * H:3 * H])
        o_g = jax.nn.sigmoid(gates[:, 3 * H:4 * H])
        c_new = f_g * c + i_g * g_g
        h_new = o_g * jnp.tanh(c_new)
        return h_new, c_new

    h_l, c_l = feat_left[:, :H], feat_left[:, H:]
    h_r, c_r = feat_right[:, :H], feat_right[:, H:]
    h_lo, c_lo = lstm_cell(x_left, h_l, c_l)
    h_ro, c_ro = lstm_cell(x_right, h_r, c_r)
    return jnp.concatenate([h_lo + h_ro, c_lo + c_ro], axis=1)


# ------------------------------ main ------------------------------------------
if __name__ == "__main__":
    key = jax.random.PRNGKey(0)
    k_xl, k_xr, k_fl, k_fr, k_wih, k_whh, k_bih, k_bhh = jax.random.split(key, 8)

    # One tree level worth of (left, right) node pairs; exercises the batch grid
    # (2 blocks of 512) and the padding path (1000 -> 1024).
    n = 1000

    x_left = jax.random.normal(k_xl, (n, IN_CHANNEL), dtype=jnp.float32)
    x_right = jax.random.normal(k_xr, (n, IN_CHANNEL), dtype=jnp.float32)
    feat_left = jax.random.normal(k_fl, (n, N_FEATURE), dtype=jnp.float32)
    feat_right = jax.random.normal(k_fr, (n, N_FEATURE), dtype=jnp.float32)

    # Deterministic LSTMCell params, PyTorch-style uniform(-1/sqrt(H), 1/sqrt(H))
    bound = 1.0 / np.sqrt(HIDDEN)
    params = {
        "weight_ih": jax.random.uniform(k_wih, (4 * HIDDEN, IN_CHANNEL),
                                        minval=-bound, maxval=bound,
                                        dtype=jnp.float32),
        "weight_hh": jax.random.uniform(k_whh, (4 * HIDDEN, HIDDEN),
                                        minval=-bound, maxval=bound,
                                        dtype=jnp.float32),
        "bias_ih": jax.random.uniform(k_bih, (4 * HIDDEN,),
                                      minval=-bound, maxval=bound,
                                      dtype=jnp.float32),
        "bias_hh": jax.random.uniform(k_bhh, (4 * HIDDEN,),
                                      minval=-bound, maxval=bound,
                                      dtype=jnp.float32),
    }

    # One-time packing, hoisted out of the per-call path.
    w_fused, bias = jax.block_until_ready(pack_params(params))

    ref = jax.block_until_ready(
        encoder_reference(x_left, x_right, feat_left, feat_right, params))

    # f32 path (strict parity: precision=HIGHEST in-kernel).
    out = encoder_forward(x_left, x_right, feat_left, feat_right, w_fused, bias,
                          block_n=512, gemm_dtype=jnp.float32)
    out = jax.block_until_ready(out)
    assert out.shape == (n, N_FEATURE), out.shape
    np.testing.assert_allclose(np.asarray(out), np.asarray(ref),
                               rtol=1e-5, atol=1e-5)

    # bf16 GEMM-operand path (halves streamed activation bytes; gate/cell math f32).
    out_bf16 = encoder_forward(x_left, x_right, feat_left, feat_right,
                               w_fused, bias, block_n=512,
                               gemm_dtype=jnp.bfloat16)
    out_bf16 = jax.block_until_ready(out_bf16)
    np.testing.assert_allclose(np.asarray(out_bf16), np.asarray(ref),
                               rtol=5e-2, atol=5e-2)

    # TODO(synk): for full trees, call encoder_forward once per level with that
    # level's node-pair batch; per-level calls are already grid-pipelined here.
    print("KERNEL_OK")
</pallas_src>

<mosaic_0001>
module attributes {stable_mosaic.version = 11 : i64} {
  func.func @encoder_kernel(%arg0: i32, %arg1: memref<2x27x512xf32, #tpu.memory_space<vmem>>, %arg2: memref<2x8x512xf32, #tpu.memory_space<vmem>>, %arg3: memref<32x27xf32, #tpu.memory_space<vmem>>, %arg4: memref<32x1xf32, #tpu.memory_space<vmem>>, %arg5: memref<16x512xf32, #tpu.memory_space<vmem>>) attributes {dimension_semantics = [#tpu.dimension_semantics<parallel>], iteration_bounds = array<i64: 2>, scalar_prefetch = 0 : i64, scratch_operands = 0 : i64, tpu.core_type = #tpu.core_type<tc>, window_params = [{transform_indices = @transform_0, window_bounds = array<i64: 2, 27, 512>}, {transform_indices = @transform_1, window_bounds = array<i64: 2, 8, 512>}, {pipeline_mode = #tpu.pipeline_mode<synchronous>, transform_indices = @transform_2, window_bounds = array<i64: 32, 27>}, {pipeline_mode = #tpu.pipeline_mode<synchronous>, transform_indices = @transform_3, window_bounds = array<i64: 32, 1>}, {transform_indices = @transform_4, window_bounds = array<i64: 16, 512>}]} {
    %c0 = arith.constant 0 : index
    %c0_0 = arith.constant 0 : index
    %0 = vector.load %arg3[%c0, %c0_0] : memref<32x27xf32, #tpu.memory_space<vmem>>, vector<32x27xf32>
    %c0_1 = arith.constant 0 : index
    %c0_2 = arith.constant 0 : index
    %1 = vector.load %arg4[%c0_1, %c0_2] : memref<32x1xf32, #tpu.memory_space<vmem>>, vector<32x1xf32>
    %c0_3 = arith.constant 0 : index
    %c0_4 = arith.constant 0 : index
    %c0_5 = arith.constant 0 : index
    %2 = vector.load %arg1[%c0_3, %c0_4, %c0_5] : memref<2x27x512xf32, #tpu.memory_space<vmem>>, vector<1x27x512xf32>
    %3 = vector.shape_cast %2 : vector<1x27x512xf32> to vector<27x512xf32>
    %cst = arith.constant dense<0.000000e+00> : vector<32x512xf32>
    %4 = tpu.matmul %0, %3, %cst {dimension_numbers = #tpu.dot_dimension_numbers<[1], [0], [0], [1], [0, 0, 1, 1], [], []>, precision = #tpu.contract_precision<fp32>} : vector<32x27xf32>, vector<27x512xf32>, vector<32x512xf32> -> vector<32x512xf32>
    %5 = vector.broadcast %1 : vector<32x1xf32> to vector<32x512xf32>
    %6 = arith.addf %4, %5 : vector<32x512xf32>
    %7 = vector.extract_strided_slice %6 {offsets = [0, 0], sizes = [24, 512], strides = [1, 1]} : vector<32x512xf32> to vector<24x512xf32>
    %8 = arith.negf %7 : vector<24x512xf32>
    %9 = math.exp %8 : vector<24x512xf32>
    %cst_6 = arith.constant 1.000000e+00 : f32
    %10 = vector.broadcast %cst_6 : f32 to vector<24x512xf32>
    %11 = arith.addf %10, %9 : vector<24x512xf32>
    %12 = arith.divf %10, %11 : vector<24x512xf32>
    %13 = vector.extract_strided_slice %6 {offsets = [24, 0], sizes = [8, 512], strides = [1, 1]} : vector<32x512xf32> to vector<8x512xf32>
    %14 = math.tanh %13 : vector<8x512xf32>
    %15 = vector.extract_strided_slice %12 {offsets = [0, 0], sizes = [8, 512], strides = [1, 1]} : vector<24x512xf32> to vector<8x512xf32>
    %16 = vector.extract_strided_slice %12 {offsets = [8, 0], sizes = [8, 512], strides = [1, 1]} : vector<24x512xf32> to vector<8x512xf32>
    %17 = vector.extract_strided_slice %12 {offsets = [16, 0], sizes = [8, 512], strides = [1, 1]} : vector<24x512xf32> to vector<8x512xf32>
    %c0_7 = arith.constant 0 : index
    %c0_8 = arith.constant 0 : index
    %c0_9 = arith.constant 0 : index
    %18 = vector.load %arg2[%c0_7, %c0_8, %c0_9] : memref<2x8x512xf32, #tpu.memory_space<vmem>>, vector<1x8x512xf32>
    %19 = vector.shape_cast %18 : vector<1x8x512xf32> to vector<8x512xf32>
    %20 = arith.mulf %16, %19 : vector<8x512xf32>
    %21 = arith.mulf %15, %14 : vector<8x512xf32>
    %22 = arith.addf %20, %21 : vector<8x512xf32>
    %23 = math.tanh %22 : vector<8x512xf32>
    %24 = arith.mulf %17, %23 : vector<8x512xf32>
    %c1 = arith.constant 1 : index
    %c0_10 = arith.constant 0 : index
    %c0_11 = arith.constant 0 : index
    %25 = vector.load %arg1[%c1, %c0_10, %c0_11] : memref<2x27x512xf32, #tpu.memory_space<vmem>>, vector<1x27x512xf32>
    %26 = vector.shape_cast %25 : vector<1x27x512xf32> to vector<27x512xf32>
    %cst_12 = arith.constant dense<0.000000e+00> : vector<32x512xf32>
    %27 = tpu.matmul %0, %26, %cst_12 {dimension_numbers = #tpu.dot_dimension_numbers<[1], [0], [0], [1], [0, 0, 1, 1], [], []>, precision = #tpu.contract_precision<fp32>} : vector<32x27xf32>, vector<27x512xf32>, vector<32x512xf32> -> vector<32x512xf32>
    %28 = vector.broadcast %1 : vector<32x1xf32> to vector<32x512xf32>
    %29 = arith.addf %27, %28 : vector<32x512xf32>
    %30 = vector.extract_strided_slice %29 {offsets = [0, 0], sizes = [24, 512], strides = [1, 1]} : vector<32x512xf32> to vector<24x512xf32>
    %31 = arith.negf %30 : vector<24x512xf32>
    %32 = math.exp %31 : vector<24x512xf32>
    %cst_13 = arith.constant 1.000000e+00 : f32
    %33 = vector.broadcast %cst_13 : f32 to vector<24x512xf32>
    %34 = arith.addf %33, %32 : vector<24x512xf32>
    %35 = arith.divf %33, %34 : vector<24x512xf32>
    %36 = vector.extract_strided_slice %29 {offsets = [24, 0], sizes = [8, 512], strides = [1, 1]} : vector<32x512xf32> to vector<8x512xf32>
    %37 = math.tanh %36 : vector<8x512xf32>
    %38 = vector.extract_strided_slice %35 {offsets = [0, 0], sizes = [8, 512], strides = [1, 1]} : vector<24x512xf32> to vector<8x512xf32>
    %39 = vector.extract_strided_slice %35 {offsets = [8, 0], sizes = [8, 512], strides = [1, 1]} : vector<24x512xf32> to vector<8x512xf32>
    %40 = vector.extract_strided_slice %35 {offsets = [16, 0], sizes = [8, 512], strides = [1, 1]} : vector<24x512xf32> to vector<8x512xf32>
    %c1_14 = arith.constant 1 : index
    %c0_15 = arith.constant 0 : index
    %c0_16 = arith.constant 0 : index
    %41 = vector.load %arg2[%c1_14, %c0_15, %c0_16] : memref<2x8x512xf32, #tpu.memory_space<vmem>>, vector<1x8x512xf32>
    %42 = vector.shape_cast %41 : vector<1x8x512xf32> to vector<8x512xf32>
    %43 = arith.mulf %39, %42 : vector<8x512xf32>
    %44 = arith.mulf %38, %37 : vector<8x512xf32>
    %45 = arith.addf %43, %44 : vector<8x512xf32>
    %46 = math.tanh %45 : vector<8x512xf32>
    %47 = arith.mulf %40, %46 : vector<8x512xf32>
    %48 = arith.addf %24, %47 : vector<8x512xf32>
    %49 = arith.addf %22, %45 : vector<8x512xf32>
    %c0_17 = arith.constant 0 : index
    %c0_18 = arith.constant 0 : index
    %50 = vector.load %arg5[%c0_17, %c0_18] : memref<16x512xf32, #tpu.memory_space<vmem>>, vector<8x512xf32>
    tpu.vector_store %arg5[%c0_17, %c0_18], %48 {strides = array<i32>} : memref<16x512xf32, #tpu.memory_space<vmem>>, vector<8x512xf32>,
    %c8 = arith.constant 8 : index
    %c0_19 = arith.constant 0 : index
    %51 = vector.load %arg5[%c8, %c0_19] : memref<16x512xf32, #tpu.memory_space<vmem>>, vector<8x512xf32>
    tpu.vector_store %arg5[%c8, %c0_19], %49 {strides = array<i32>} : memref<16x512xf32, #tpu.memory_space<vmem>>, vector<8x512xf32>,
    return
  }
  func.func @transform_0(%arg0: i32) -> (i32, i32, i32) {
    %c0_i32 = arith.constant 0 : i32
    %c0_i32_0 = arith.constant 0 : i32
    %c0_i32_1 = arith.constant 0 : i32
    return %c0_i32, %c0_i32_0, %arg0 : i32, i32, i32
  }
  func.func @transform_1(%arg0: i32) -> (i32, i32, i32) {
    %c0_i32 = arith.constant 0 : i32
    %c0_i32_0 = arith.constant 0 : i32
    %c0_i32_1 = arith.constant 0 : i32
    return %c0_i32, %c0_i32_0, %arg0 : i32, i32, i32
  }
  func.func @transform_2(%arg0: i32) -> (i32, i32) {
    %c0_i32 = arith.constant 0 : i32
    %c0_i32_0 = arith.constant 0 : i32
    %c0_i32_1 = arith.constant 0 : i32
    return %c0_i32, %c0_i32_0 : i32, i32
  }
  func.func @transform_3(%arg0: i32) -> (i32, i32) {
    %c0_i32 = arith.constant 0 : i32
    %c0_i32_0 = arith.constant 0 : i32
    %c0_i32_1 = arith.constant 0 : i32
    return %c0_i32, %c0_i32_0 : i32, i32
  }
  func.func @transform_4(%arg0: i32) -> (i32, i32) {
    %c0_i32 = arith.constant 0 : i32
    %c0_i32_0 = arith.constant 0 : i32
    return %c0_i32, %arg0 : i32, i32
  }
}

</mosaic_0001>

<bundles_post_ra>
// kernel: encoder_forward.1
= control target key start
LH: loop header
LB: loop body
LE: loop exit
PB: predicated region body
PF: predicated region fallthrough
CT: control target
= control target key end

     0   :  { %s3795_s15 = smov 0   ;;  %s3797_s16 = smov 0   ;;  %s4976_s0 = inlined_call_operand.vmem [shape: f32[2,27,1024], index: 0, kind: input, shape index: {}]   ;;  %s4977_s1 = inlined_call_operand.vmem [shape: f32[2,8,1024], index: 1, kind: input, shape index: {}]   ;;  %s4978_s2 = inlined_call_operand.vmem [shape: f32[32,27], index: 2, kind: input, shape index: {}]   ;;  %s4979_s3 = inlined_call_operand.vmem [shape: f32[32,1], index: 3, kind: input, shape index: {}]   ;;  %s4980_s4 = inlined_call_operand.vmem [shape: f32[16,1024], index: 4, kind: output, shape index: {}]  }
   0x1   :  { %s3799_s17 = smov 0  }
   0x2 LB: > { %s3522_s18 = sadd.s32 4294967295, %s3766_s17   ;;  %s3812_s19 = sadd.s32 1, %s3766_s17   ;;  %s3766_s17 = sphi %s3799_s17, %s4985_s17   ;;  %s3762_s16 = sphi %s3797_s16, %s4984_s16   ;;  %s3758_s15 = sphi %s3795_s15, %s4983_s15  }
   0x3   : > { %s18_s20 = ssub.s32 %s3766_s17, %s3812_s19  ;;  %s21_s21 = sadd.s32 1, %s3762_s16 }
   0x4   : > { %p19_p0 = scmp.eq.s32.totalorder %s18_s20, 0  ;;  %p28_p1 = scmp.ne.s32.totalorder %s3762_s16, %s3758_s15 }
   0x5   : > { %p29_p2 = scmp.eq.s32.totalorder %s3766_s17, 0  ;;  %p126_p3 = scmp.eq.s32.totalorder %s3522_s18, 1 }
   0x6   : > { %s3823_s22 = scalar_select %p19_p0, %s3762_s16, %s21_s21  }
   0x7   : > { %p3825_p4 = por %p29_p2, %p28_p1  ;;  %p3829_p5 = por %p126_p3, %p28_p1 }
   0x8   : > { %p3525_p6 = scmp.ge.s32.totalorder %s3766_s17, 2 }
   0xa   : > { %154 = sbr.rel (%p3525_p6) target bundleno = 43 (0x2b), region = 24 }
   0xf   : > { %157 = sbr.rel (!%p3825_p4) target bundleno = 35 (0x23), region = 28  ;;  %s159_s25 = sand.u32 (%p3825_p4), 1, %s3762_s16  }
  0x10   : > { %s3585_s26 = sshll.u32 (%p3825_p4), %s3766_s17, 5  ;;  %s3526_s27 = sshll.u32 (%p3825_p4), %s159_s25, 8 }
  0x11   : > { %s3841_s30 = scalar_lea.vmem (%p3825_p4), %s4976_s0, %s3585_s26  ;;  %s3846_s5 = scalar_lea.vmem (%p3825_p4), [#allocation2], %s3526_s27 }
  0x12   : > { %v177_v0 = vld [vmem:[%s3841_s30] sm:$0xff] (%p3825_p4)  ;;  %v179_v1 = vld [vmem:[%s3841_s30 + $0x8] sm:$0xff] (%p3825_p4)  ;;  %v181_v2 = vld [vmem:[%s3841_s30 + $0x10] sm:$0xff] (%p3825_p4) }
  0x13   : > { %178 = vst [vmem:[%s3846_s5] sm:$0xff] (%p3825_p4), %v177_v0  ;;  %180 = vst [vmem:[%s3846_s5 + $0x8] sm:$0xff] (%p3825_p4), %v179_v1  ;;  %v183_v3 = vld [vmem:[%s3841_s30 + $0x18] sm:$0xff] (%p3825_p4)  ;;  %v185_v4 = vld [vmem:[%s3841_s30 + $0x40] sm:$0xff] (%p3825_p4) }
  0x14   : > { %182 = vst [vmem:[%s3846_s5 + $0x10] sm:$0xff] %v181_v2  ;;  %v187_v5 = vld [vmem:[%s3841_s30 + $0x48] sm:$0xff]  ;;  %184 = vst [vmem:[%s3846_s5 + $0x18] sm:$0xff] %v183_v3  ;;  %v189_v6 = vld [vmem:[%s3841_s30 + $0x50] sm:$0xff] }
  0x15   : > { %186 = vst [vmem:[%s3846_s5 + $0x20] sm:$0xff] %v185_v4  ;;  %188 = vst [vmem:[%s3846_s5 + $0x28] sm:$0xff] %v187_v5  ;;  %v191_v7 = vld [vmem:[%s3841_s30 + $0x58] sm:$0xff]  ;;  %v193_v8 = vld [vmem:[%s3841_s30 + $0x80] sm:$0xff] }
  0x16   : > { %190 = vst [vmem:[%s3846_s5 + $0x30] sm:$0xff] %v189_v6  ;;  %192 = vst [vmem:[%s3846_s5 + $0x38] sm:$0xff] %v191_v7  ;;  %v195_v9 = vld [vmem:[%s3841_s30 + $0x88] sm:$0xff]  ;;  %v197_v10 = vld [vmem:[%s3841_s30 + $0x90] sm:$0xff] }
  0x17   : > { %194 = vst [vmem:[%s3846_s5 + $0x40] sm:$0xff] %v193_v8  ;;  %v199_v11 = vld [vmem:[%s3841_s30 + $0x98] sm:$0xff]  ;;  %196 = vst [vmem:[%s3846_s5 + $0x48] sm:$0xff] %v195_v9  ;;  %v201_v12 = vld [vmem:[%s3841_s30 + $0xc0] sm:$0xff] }
  0x18   : > { %198 = vst [vmem:[%s3846_s5 + $0x50] sm:$0xff] %v197_v10  ;;  %200 = vst [vmem:[%s3846_s5 + $0x58] sm:$0xff] %v199_v11  ;;  %v203_v13 = vld [vmem:[%s3841_s30 + $0xc8] sm:$0xff]  ;;  %v205_v14 = vld [vmem:[%s3841_s30 + $0xd0] sm:$0xff] }
  0x19   : > { %202 = vst [vmem:[%s3846_s5 + $0x60] sm:$0xff] %v201_v12  ;;  %204 = vst [vmem:[%s3846_s5 + $0x68] sm:$0xff] %v203_v13  ;;  %v207_v15 = vld [vmem:[%s3841_s30 + $0xd8] sm:$0xff]  ;;  %v209_v16 = vld [vmem:[%s3841_s30 + $0x100] sm:$0xff] }
  0x1a   : > { %206 = vst [vmem:[%s3846_s5 + $0x70] sm:$0xff] %v205_v14  ;;  %v211_v17 = vld [vmem:[%s3841_s30 + $0x108] sm:$0xff]  ;;  %208 = vst [vmem:[%s3846_s5 + $0x78] sm:$0xff] %v207_v15  ;;  %v213_v18 = vld [vmem:[%s3841_s30 + $0x110] sm:$0xff] }
  0x1b   : > { %210 = vst [vmem:[%s3846_s5 + $0x80] sm:$0xff] %v209_v16  ;;  %212 = vst [vmem:[%s3846_s5 + $0x88] sm:$0xff] %v211_v17  ;;  %v215_v19 = vld [vmem:[%s3841_s30 + $0x118] sm:$0xff]  ;;  %v217_v20 = vld [vmem:[%s3841_s30 + $0x140] sm:$0xff] }
  0x1c   : > { %214 = vst [vmem:[%s3846_s5 + $0x90] sm:$0xff] %v213_v18  ;;  %216 = vst [vmem:[%s3846_s5 + $0x98] sm:$0xff] %v215_v19  ;;  %v219_v21 = vld [vmem:[%s3841_s30 + $0x148] sm:$0xff]  ;;  %v221_v22 = vld [vmem:[%s3841_s30 + $0x150] sm:$0xff] }
  0x1d   : > { %218 = vst [vmem:[%s3846_s5 + $0xa0] sm:$0xff] %v217_v20  ;;  %v223_v23 = vld [vmem:[%s3841_s30 + $0x158] sm:$0xff]  ;;  %220 = vst [vmem:[%s3846_s5 + $0xa8] sm:$0xff] %v219_v21  ;;  %v225_v24 = vld [vmem:[%s3841_s30 + $0x180] sm:$0xff] }
  0x1e   : > { %222 = vst [vmem:[%s3846_s5 + $0xb0] sm:$0xff] %v221_v22  ;;  %224 = vst [vmem:[%s3846_s5 + $0xb8] sm:$0xff] %v223_v23  ;;  %v227_v25 = vld [vmem:[%s3841_s30 + $0x188] sm:$0xff]  ;;  %v229_v26 = vld [vmem:[%s3841_s30 + $0x190] sm:$0xff] }
  0x1f   : > { %226 = vst [vmem:[%s3846_s5 + $0xc0] sm:$0xff] %v225_v24  ;;  %228 = vst [vmem:[%s3846_s5 + $0xc8] sm:$0xff] %v227_v25  ;;  %v231_v27 = vld [vmem:[%s3841_s30 + $0x198] sm:$0xff]  ;;  %v233_v28 = vld [vmem:[%s3841_s30 + $0x1c0] sm:$0xff] }
  0x20   : > { %230 = vst [vmem:[%s3846_s5 + $0xd0] sm:$0xff] %v229_v26  ;;  %v235_v29 = vld [vmem:[%s3841_s30 + $0x1c8] sm:$0xff]  ;;  %232 = vst [vmem:[%s3846_s5 + $0xd8] sm:$0xff] %v231_v27  ;;  %v237_v30 = vld [vmem:[%s3841_s30 + $0x1d0] sm:$0xff] }
  0x21   : > { %234 = vst [vmem:[%s3846_s5 + $0xe0] sm:$0xff] %v233_v28  ;;  %236 = vst [vmem:[%s3846_s5 + $0xe8] sm:$0xff] %v235_v29  ;;  %v239_v31 = vld [vmem:[%s3841_s30 + $0x1d8] sm:$0xff] }
  0x22   : > { %238 = vst [vmem:[%s3846_s5 + $0xf0] sm:$0xff] %v237_v30  ;;  %240 = vst [vmem:[%s3846_s5 + $0xf8] sm:$0xff] %v239_v31 }
  0x23 PF: > { %246 = sbr.rel (!%p3825_p4) target bundleno = 43 (0x2b), region = 51  ;;  %s248_s6 = sand.u32 (%p3825_p4), 1, %s3762_s16  }
  0x24   : > { %s3586_s7 = sshll.u32 (%p3825_p4), %s3766_s17, 5  ;;  %s3529_s8 = sshll.u32 (%p3825_p4), %s248_s6, 6 }
  0x25   : > { %s253_s11 = scalar_lea.vmem (%p3825_p4), %s4977_s1, %s3586_s7  ;;  %s250_s12 = scalar_lea.vmem (%p3825_p4), [#allocation3], %s3529_s8 }
  0x26   : > { %v266_v32 = vld [vmem:[%s253_s11] sm:$0xff] (%p3825_p4)  ;;  %v268_v33 = vld [vmem:[%s253_s11 + $0x8] sm:$0xff] (%p3825_p4)  ;;  %v270_v34 = vld [vmem:[%s253_s11 + $0x10] sm:$0xff] (%p3825_p4) }
  0x27   : > { %267 = vst [vmem:[%s250_s12] sm:$0xff] (%p3825_p4), %v266_v32  ;;  %269 = vst [vmem:[%s250_s12 + $0x8] sm:$0xff] (%p3825_p4), %v268_v33  ;;  %v272_v35 = vld [vmem:[%s253_s11 + $0x18] sm:$0xff] (%p3825_p4)  ;;  %v274_v36 = vld [vmem:[%s253_s11 + $0x40] sm:$0xff] (%p3825_p4) }
  0x28   : > { %271 = vst [vmem:[%s250_s12 + $0x10] sm:$0xff] %v270_v34  ;;  %v276_v37 = vld [vmem:[%s253_s11 + $0x48] sm:$0xff]  ;;  %273 = vst [vmem:[%s250_s12 + $0x18] sm:$0xff] %v272_v35  ;;  %v278_v38 = vld [vmem:[%s253_s11 + $0x50] sm:$0xff] }
  0x29   : > { %275 = vst [vmem:[%s250_s12 + $0x20] sm:$0xff] %v274_v36  ;;  %277 = vst [vmem:[%s250_s12 + $0x28] sm:$0xff] %v276_v37  ;;  %v280_v39 = vld [vmem:[%s253_s11 + $0x58] sm:$0xff] }
  0x2a   : > { %279 = vst [vmem:[%s250_s12 + $0x30] sm:$0xff] %v278_v38  ;;  %281 = vst [vmem:[%s250_s12 + $0x38] sm:$0xff] %v280_v39 }
  0x2b PF: > { %p3532_p7 = scmp.ge.s32.totalorder %s3766_s17, 1  ;;  %p286_p8 = scmp.lt.s32.totalorder %s3766_s17, 3 }
  0x2d   : > { %p287_p9 = pnand %p3532_p7, %p286_p8 }
  0x2e   : > { %s293_s13 = sand.u32 (!%p287_p9), 1, %s3758_s15  }
  0x2f   : > { %290 = sbr.rel (%p287_p9) target bundleno = 516 (0x204), region = 74  ;;  %s3533_s25 = sshll.u32 (!%p287_p9), %s293_s13, 8 }
  0x30   : > { %s3946_s6 = scalar_lea.vmem (!%p287_p9), [#allocation2], %s3533_s25  ;;  %s4757_s14 = sshll.u32 (!%p287_p9), %s293_s13, 6 }
  0x31   : > { %s4760_s15 = scalar_lea.vmem (!%p287_p9), [#allocation3], %s4757_s14  ;;  %s4911_s13 = scalar_lea.vmem (!%p287_p9), [#allocation4], %s4757_s14 }
  0x34   : > { %vm388_vm0 = vcmask 1042432   ;;  %v331_v40 = vld [vmem:[%s4978_s2] sm:$0xff]  ;;  %vm375_vm1 = vcmask 220160   ;;  %v332_v41 = vld [vmem:[%s4978_s2 + $0x8] sm:$0xff]  ;;  %v3768_v42 = vmov 0.0   ;;  %v333_v45 = vld [vmem:[%s4978_s2 + $0x10] sm:$0xff] }
  0x35   : > { %473 = vmatprep.mubr.f32.mxu0 %v3768_v42  ;;  %v377_v43 = vsel %vm375_vm1, %v331_v40, 0  ;;  %v380_v44 = vsel %vm375_vm1, %v332_v41, 0  ;;  %622 = vmatprep.mubr.f32.mxu1 %v3768_v42  ;;  %v334_v46 = vld [vmem:[%s4978_s2 + $0x18] sm:$0xff]  ;;  %v3939_v49 = vsel %vm375_vm1, %v333_v45, 0  ;;  %v3769_v51 = vmov 0   ;;  %v335_v52 = vld [vmem:[%s4979_s3] sm:$0xff] }
  0x36   : > { %v3935_v47 = vand.u32 4294901760, %v377_v43  ;;  %v3937_v48 = vand.u32 4294901760, %v380_v44  ;;  %v3941_v50 = vsel %vm375_vm1, %v334_v46, 0  ;;  %3614 = vset.pattern.permute.xlu0 %v3769_v51  ;;  %3615 = vset.pattern.permute.xlu1 %v3769_v51  ;;  %v352_v53 = vld [vmem:[%s3946_s6 + $0x68] sm:$0x7]  ;;  %v3952_v56 = vand.u32 4294901760, %v3939_v49 }
  0x37   : > { %v351_v54 = vld [vmem:[%s3946_s6 + $0x60] sm:$0x7]  ;;  %v348_v55 = vld [vmem:[%s3946_s6 + $0x48] sm:$0xff]  ;;  %357 = vperm.xlu0 %3614, %v335_v52   ;;  %v393_v57 = vsel %vm388_vm0, %v352_v53, 0  ;;  %v337_v27 = vld [vmem:[%s4979_s3 + $0x10] sm:$0xff]  ;;  %v4066_v46 = vand.u32 4294901760, %v3941_v50 }
  0x38   : > { %v390_v58 = vsel %vm388_vm0, %v351_v54, 0  ;;  %v3956_v59 = vand.u32 4294901760, %v348_v55  ;;  %v347_v60 = vld [vmem:[%s3946_s6 + $0x40] sm:$0xff]  ;;  %v344_v61 = vld [vmem:[%s3946_s6 + $0x28] sm:$0xff]  ;;  %v3962_v63 = vsub.f32 %v377_v43, %v3935_v47  ;;  %v3964_v0 = vand.u32 4294901760, %v393_v57  ;;  %367 = vperm.xlu1 %3615, %v337_v27   ;;  %s3587_s20 = sshll.u32 (%p3829_p5), %s3522_s18, 5 }
  0x39   : > { %v343_v62 = vld [vmem:[%s3946_s6 + $0x20] sm:$0xff]  ;;  %v3966_v1 = vand.u32 4294901760, %v390_v58  ;;  %v3968_v2 = vand.u32 4294901760, %v347_v60  ;;  %v3970_v3 = vand.u32 4294901760, %v344_v61  ;;  %v340_v4 = vld [vmem:[%s3946_s6 + $0x8] sm:$0xff]  ;;  %v4000_v15 = vsub.f32 %v380_v44, %v3937_v48  ;;  %s3416_s25 = scalar_lea.vmem (%p3829_p5), %s4980_s4, %s3587_s20 }
  0x3a   : > { %v339_v5 = vld [vmem:[%s3946_s6] sm:$0xff]  ;;  %v3974_v6 = vand.u32 4294901760, %v343_v62  ;;  %v3976_v7 = vand.u32 4294901760, %v340_v4  ;;  %v3981_v9 = vand.u32 4294901760, %v3962_v63  ;;  %426 = vmatprep.subr.mxu0 %v3964_v0  ;;  %v3985_v10 = vsub.f32 %v393_v57, %v3964_v0  ;;  %v336_v22 = vld [vmem:[%s4979_s3 + $0x8] sm:$0xff] }
  0x3b   : > { %v3978_v8 = vand.u32 4294901760, %v339_v5  ;;  %v3988_v11 = vsub.f32 %v390_v58, %v3966_v1  ;;  %v3991_v12 = vsub.f32 %v348_v55, %v3956_v59  ;;  %v3994_v13 = vsub.f32 %v347_v60, %v3968_v2  ;;  %428 = vmatpush1.msra.mxu0 %v3966_v1  ;;  %362 = vperm.xlu0 %3614, %v336_v22   ;;  %v3560_v22 = vld [vmem:[%s3946_s6 + $0xe0] sm:$0x7] }
  0x3c   : > { %v477_v14 = vsub.f32 %v3962_v63, %v3981_v9  ;;  %v4003_v16 = vsub.f32 %v344_v61, %v3970_v3  ;;  %v4006_v17 = vsub.f32 %v343_v62, %v3974_v6  ;;  %430 = vmatprep.subr.mxu0 %v3956_v59  ;;  %v544_v18 = vand.u32 4294901760, %v3985_v10 }
  0x3d   : > { %v550_v19 = vand.u32 4294901760, %v3988_v11  ;;  %v556_v20 = vand.u32 4294901760, %v3991_v12  ;;  %v562_v21 = vand.u32 4294901760, %v3994_v13  ;;  %432 = vmatpush1.msra.mxu0 %v3968_v2  ;;  %v4020_v24 = vand.u32 4294901760, %v4000_v15 }
  0x3e   : > { %v4017_v23 = vand.u32 4294901760, %v477_v14  ;;  %v568_v25 = vand.u32 4294901760, %v4003_v16  ;;  %v574_v26 = vand.u32 4294901760, %v4006_v17  ;;  %434 = vmatprep.subr.mxu0 %v3970_v3  ;;  %v545_v28 = vsub.f32 %v3985_v10, %v544_v18  ;;  %v3561_v14 = vld [vmem:[%s3946_s6 + $0xe8] sm:$0x7] }
  0x3f   : > { %v551_v29 = vsub.f32 %v3988_v11, %v550_v19  ;;  %v557_v30 = vsub.f32 %v3991_v12, %v556_v20  ;;  %v563_v31 = vsub.f32 %v3994_v13, %v562_v21  ;;  %436 = vmatpush1.msra.mxu0 %v3974_v6  ;;  %v488_v32 = vsub.f32 %v4000_v15, %v4020_v24 }
  0x40   : > { %v569_v33 = vsub.f32 %v4003_v16, %v568_v25  ;;  %v575_v34 = vsub.f32 %v4006_v17, %v574_v26  ;;  %v4050_v35 = vsub.f32 %v340_v4, %v3976_v7  ;;  %438 = vmatprep.subr.mxu0 %v3976_v7  ;;  %v546_v36 = vand.u32 4294901760, %v545_v28 }
  0x41   : > { %v552_v37 = vand.u32 4294901760, %v551_v29  ;;  %v558_v38 = vand.u32 4294901760, %v557_v30  ;;  %440 = vmatpush1.msra.mxu0 %v3978_v8  ;;  %v564_v39 = vand.u32 4294901760, %v563_v31  ;;  %v4054_v40 = vand.u32 4294901760, %v488_v32  ;;  %v354_v29 = vld [vmem:[%s3946_s6 + $0x78] sm:$0x7] }
  0x42   : > { %v580_v41 = vand.u32 4294901760, %v4050_v35  ;;  %479 = vmatmul.mubr.f32.vlgmr.msra.gmra.mxu0 %v4017_v23  ;;  %547 = vmatprep.subr.mxu1 %v546_v36  ;;  %v570_v43 = vand.u32 4294901760, %v569_v33  ;;  %v4059_v44 = vsub.f32 %v339_v5, %v3978_v8  ;;  %v4063_v45 = vsub.f32 %v3939_v49, %v3952_v56  ;;  %v353_v30 = vld [vmem:[%s3946_s6 + $0x70] sm:$0x7]  ;;  %v3563_v31 = vld [vmem:[%s3946_s6 + $0xf8] sm:$0x7] }
  0x43   : > { %553 = vmatpush1.msra.mxu1 %v552_v37  ;;  %484 = vmatprep.mubr.f32.mxu0 %v3768_v42  ;;  %v576_v51 = vand.u32 4294901760, %v575_v34  ;;  %v4079_v49 = vsub.f32 %v3941_v50, %v4066_v46  ;;  %v338_v50 = vld [vmem:[%s4979_s3 + $0x18] sm:$0xff]  ;;  %v4113_v27 = vsel %vm388_vm0, %v3561_v14, 0  ;;  %v4120_v28 = vsel %vm388_vm0, %v3560_v22, 0  ;;  %v3562_v37 = vld [vmem:[%s3946_s6 + $0xf0] sm:$0x7] }
  0x44   : > { %v581_v52 = vsub.f32 %v4050_v35, %v580_v41  ;;  %559 = vmatprep.subr.mxu1 %v558_v38  ;;  %677 = vmatprep.subr.mxu0 %v3985_v10  ;;  %v586_v53 = vand.u32 4294901760, %v4059_v44  ;;  %v4075_v54 = vand.u32 4294901760, %v4063_v45  ;;  %v399_v32 = vsel %vm388_vm0, %v354_v29, 0  ;;  %v350_v38 = vld [vmem:[%s3946_s6 + $0x58] sm:$0xff]  ;;  %v349_v10 = vld [vmem:[%s3946_s6 + $0x50] sm:$0xff] }
  0x45   : > { %565 = vmatpush1.msra.mxu1 %v564_v39  ;;  %680 = vmatpush1.msra.mxu0 %v3988_v11  ;;  %v4089_v60 = vand.u32 4294901760, %v4079_v49  ;;  %v396_v33 = vsel %vm388_vm0, %v353_v30, 0  ;;  %v4140_v34 = vsel %vm388_vm0, %v3563_v31, 0  ;;  %v4145_v36 = vand.u32 4294901760, %v399_v32 }
  0x46   : > { %v582_v55 = vand.u32 4294901760, %v581_v52  ;;  %490 = vmatmul.mubr.f32.gmra.mxu0 %v4054_v40  ;;  %571 = vmatprep.subr.mxu1 %v570_v43  ;;  %v587_v57 = vsub.f32 %v4059_v44, %v586_v53  ;;  %v499_v58 = vsub.f32 %v4063_v45, %v4075_v54  ;;  %v4153_v39 = vand.u32 4294901760, %v396_v33  ;;  %v342_v52 = vld [vmem:[%s3946_s6 + $0x18] sm:$0xff] }
  0x47   : > { %577 = vmatpush1.msra.mxu1 %v576_v51  ;;  %495 = vmatprep.mubr.f32.mxu0 %v3768_v42  ;;  %v510_v4 = vsub.f32 %v4079_v49, %v4089_v60  ;;  %v4165_v43 = vsub.f32 %v399_v32, %v4145_v36  ;;  %v4167_v51 = vand.u32 4294901760, %v350_v38  ;;  %v4176_v11 = vand.u32 4294901760, %v349_v10 }
  0x48   : > { %583 = vmatprep.subr.mxu1 %v582_v55  ;;  %v588_v61 = vand.u32 4294901760, %v587_v57  ;;  %v4095_v62 = vand.u32 4294901760, %v499_v58  ;;  %683 = vmatprep.subr.mxu0 %v3991_v12  ;;  %v346_v12 = vld [vmem:[%s3946_s6 + $0x38] sm:$0xff] }
  0x49   : > { %686 = vmatpush1.msra.mxu0 %v3994_v13  ;;  %372 = vperm.xlu1 %3615, %v338_v50   ;;  %v4102_v5 = vand.u32 4294901760, %v510_v4 }
  0x4a   : > { %589 = vmatpush1.msra.mxu1 %v588_v61  ;;  %501 = vmatmul.mubr.f32.gmra.mxu0 %v4095_v62 }
  0x4b   : > { %624 = vmatmul.mubr.f32.vlgmr.msra.gmra.mxu1 %v3935_v47  ;;  %789 = vmatprep.subr.mxu1 %v3964_v0 }
  0x4c   : > { %791 = vmatpush1.msra.mxu1 %v3966_v1  ;;  %506 = vmatprep.mubr.f32.mxu0 %v3768_v42 }
  0x4d   : > { %629 = vmatprep.mubr.f32.mxu1 %v3768_v42  ;;  %689 = vmatprep.subr.mxu0 %v4003_v16  ;;  %v4200_v16 = vand.u32 4294901760, %v346_v12 }
  0x4e   : > { %512 = vmatmul.mubr.f32.gmra.mxu0 %v4102_v5  ;;  %793 = vmatprep.subr.mxu1 %v3956_v59 }
  0x4f   : > { %631 = vmatmul.mubr.f32.gmra.mxu1 %v3937_v48  ;;  %692 = vmatpush1.msra.mxu0 %v4006_v17 }
  0x50   : > { %795 = vmatpush1.msra.mxu1 %v3968_v2  ;;  %695 = vmatprep.subr.mxu0 %v4050_v35 }
  0x51   : > { %636 = vmatprep.mubr.f32.mxu1 %v3768_v42  ;;  %698 = vmatpush1.msra.mxu0 %v4059_v44 }
  0x52   : > { %731 = vmatprep.mubr.f32.mxu0 %v3768_v42  ;;  %797 = vmatprep.subr.mxu1 %v3970_v3 }
  0x53   : > { %638 = vmatmul.mubr.f32.gmra.mxu1 %v3952_v56  ;;  %734 = vmatmul.mubr.f32.vlgmr.msra.gmra.mxu0 %v3962_v63 }
  0x54   : > { %799 = vmatpush1.msra.mxu1 %v3974_v6  ;;  %643 = vmatprep.mubr.f32.mxu1 %v3768_v42 }
  0x55   : > { %739 = vmatprep.mubr.f32.mxu0 %v3768_v42  ;;  %801 = vmatprep.subr.mxu1 %v3976_v7 }
  0x56   : > { %803 = vmatpush1.msra.mxu1 %v3978_v8  ;;  %900 = vmatprep.subr.mxu0 %v544_v18  ;;  %v4160_v18 = vsel %vm388_vm0, %v3562_v37, 0 }
  0x57   : > { %645 = vmatmul.mubr.f32.gmra.mxu1 %v4066_v46  ;;  %742 = vmatmul.mubr.f32.gmra.mxu0 %v4000_v15 }
  0x58   : > { %747 = vmatprep.mubr.f32.mxu0 %v3768_v42  ;;  %836 = vmatprep.mubr.f32.mxu1 %v3768_v42 }
  0x59   : > { %904 = vmatpush1.msra.mxu0 %v550_v19  ;;  %1015 = vmatprep.subr.mxu1 %v3964_v0  ;;  %v4174_v0 = vsub.f32 %v396_v33, %v4153_v39  ;;  %v4187_v19 = vsub.f32 %v350_v38, %v4167_v51 }
  0x5a   : > { %908 = vmatprep.subr.mxu0 %v556_v20  ;;  %v345_v20 = vld [vmem:[%s3946_s6 + $0x30] sm:$0xff] }
  0x5b   : > { %750 = vmatmul.mubr.f32.gmra.mxu0 %v4063_v45  ;;  %840 = vmatmul.mubr.f32.vlgmr.msra.gmra.mxu1 %v3981_v9  ;;  %v1240_v13 = vand.u32 4294901760, %v4174_v0  ;;  %v1246_v17 = vand.u32 4294901760, %v4187_v19 }
  0x5c   : > { %1017 = vmatpush1.msra.mxu1 %v3966_v1  ;;  %755 = vmatprep.mubr.f32.mxu0 %v3768_v42  ;;  %v1234_v1 = vand.u32 4294901760, %v4165_v43 }
  0x5d   : > { %845 = vmatprep.mubr.f32.mxu1 %v3768_v42  ;;  %912 = vmatpush1.msra.mxu0 %v562_v21  ;;  %v4205_v21 = vand.u32 4294901760, %v345_v20  ;;  %v1241_v35 = vsub.f32 %v4174_v0, %v1240_v13  ;;  %v1247_v57 = vsub.f32 %v4187_v19, %v1246_v17 }
  0x5e   : > { %916 = vmatprep.subr.mxu0 %v568_v25  ;;  %1019 = vmatprep.subr.mxu1 %v3956_v59  ;;  %v4198_v59 = vsub.f32 %v349_v10, %v4176_v11  ;;  %v341_v25 = vld [vmem:[%s3946_s6 + $0x10] sm:$0xff] }
  0x5f   : > { %758 = vmatmul.mubr.f32.gmra.mxu0 %v4079_v49  ;;  %849 = vmatmul.mubr.f32.gmra.mxu1 %v4020_v24  ;;  %v4225_v44 = vand.u32 4294901760, %v341_v25  ;;  %v4233_v55 = vsub.f32 %v345_v20, %v4205_v21  ;;  %v4323_v20 = vand.u32 4294901760, %v4113_v27 }
  0x60   : > { %920 = vmatpush1.msra.mxu0 %v574_v26  ;;  %1021 = vmatpush1.msra.mxu1 %v3968_v2  ;;  %v1235_v2 = vsub.f32 %v4165_v43, %v1234_v1  ;;  %v4215_v26 = vand.u32 4294901760, %v342_v52 }
  0x61   : > { %924 = vmatprep.subr.mxu0 %v580_v41  ;;  %854 = vmatprep.mubr.f32.mxu1 %v3768_v42  ;;  %v1252_v41 = vand.u32 4294901760, %v4198_v59  ;;  %v4251_v50 = vsub.f32 %v341_v25, %v4225_v44  ;;  %v1264_v4 = vand.u32 4294901760, %v4233_v55  ;;  %v4331_v25 = vand.u32 4294901760, %v4120_v28 }
  0x62   : > { %928 = vmatpush1.msra.mxu0 %v586_v53  ;;  %961 = vmatprep.mubr.f32.mxu0 %v3768_v42  ;;  %v4228_v53 = vsub.f32 %v346_v12, %v4200_v16  ;;  %v4241_v58 = vsub.f32 %v342_v52, %v4215_v26  ;;  %v3557_v52 = vld [vmem:[%s3946_s6 + $0xc8] sm:$0xff] }
  0x63   : > { %858 = vmatmul.mubr.f32.gmra.mxu1 %v4075_v54  ;;  %963 = vmatmul.mubr.f32.vlgmr.msra.gmra.mxu0 %v3935_v47  ;;  %v1276_v30 = vand.u32 4294901760, %v4251_v50  ;;  %v1265_v31 = vsub.f32 %v4233_v55, %v1264_v4 }
  0x64   : > { %1023 = vmatprep.subr.mxu1 %v3970_v3  ;;  %863 = vmatprep.mubr.f32.mxu1 %v3768_v42  ;;  %v1236_v3 = vand.u32 4294901760, %v1235_v2  ;;  %v1258_v61 = vand.u32 4294901760, %v4228_v53  ;;  %v1270_v14 = vand.u32 4294901760, %v4241_v58  ;;  %v4344_v2 = vand.u32 4294901760, %v3557_v52 }
  0x65   : > { %1025 = vmatpush1.msra.mxu1 %v3974_v6  ;;  %968 = vmatprep.mubr.f32.mxu0 %v3768_v42  ;;  %v1242_v6 = vand.u32 4294901760, %v1241_v35  ;;  %v1277_v37 = vsub.f32 %v4251_v50, %v1276_v30  ;;  %v1266_v38 = vand.u32 4294901760, %v1265_v31 }
  0x66   : > { %1027 = vmatprep.subr.mxu1 %v3976_v7  ;;  %1116 = vmatprep.subr.mxu0 %v4145_v36  ;;  %v1253_v7 = vsub.f32 %v4198_v59, %v1252_v41  ;;  %v1259_v29 = vsub.f32 %v4228_v53, %v1258_v61  ;;  %v1271_v32 = vsub.f32 %v4241_v58, %v1270_v14 }
  0x67   : > { %867 = vmatmul.mubr.f32.gmra.mxu1 %v4089_v60  ;;  %970 = vmatmul.mubr.f32.gmra.mxu0 %v3937_v48  ;;  %v1278_v12 = vand.u32 4294901760, %v1277_v37 }
  0x68   : > { %1029 = vmatpush1.msra.mxu1 %v3978_v8  ;;  %975 = vmatprep.mubr.f32.mxu0 %v3768_v42  ;;  %v1248_v8 = vand.u32 4294901760, %v1247_v57  ;;  %v1254_v22 = vand.u32 4294901760, %v1253_v7  ;;  %v1260_v33 = vand.u32 4294901760, %v1259_v29  ;;  %v1272_v10 = vand.u32 4294901760, %v1271_v32 }
  0x69   : > { %1062 = vmatprep.mubr.f32.mxu1 %v3768_v42  ;;  %1118 = vmatpush1.msra.mxu0 %v4153_v39 }
  0x6a   : > { %1237 = vmatprep.subr.mxu1 %v1236_v3  ;;  %1120 = vmatprep.subr.mxu0 %v4167_v51 }
  0x6b   : > { %977 = vmatmul.mubr.f32.gmra.mxu0 %v3952_v56  ;;  %1064 = vmatmul.mubr.f32.vlgmr.msra.gmra.mxu1 %v3935_v47 }
  0x6c   : > { %1243 = vmatpush1.msra.mxu1 %v1242_v6  ;;  %982 = vmatprep.mubr.f32.mxu0 %v3768_v42 }
  0x6d   : > { %1069 = vmatprep.mubr.f32.mxu1 %v3768_v42  ;;  %1122 = vmatpush1.msra.mxu0 %v4176_v11 }
  0x6e   : > { %1124 = vmatprep.subr.mxu0 %v4200_v16  ;;  %1249 = vmatprep.subr.mxu1 %v1248_v8 }
  0x6f   : > { %984 = vmatmul.mubr.f32.gmra.mxu0 %v4066_v46  ;;  %1071 = vmatmul.mubr.f32.gmra.mxu1 %v3937_v48 }
  0x70   : > { %1126 = vmatpush1.msra.mxu0 %v4205_v21  ;;  %1255 = vmatpush1.msra.mxu1 %v1254_v22 }
  0x71   : > { %1128 = vmatprep.subr.mxu0 %v4215_v26  ;;  %1076 = vmatprep.mubr.f32.mxu1 %v3768_v42 }
  0x72   : > { %1130 = vmatpush1.msra.mxu0 %v4225_v44  ;;  %1163 = vmatprep.mubr.f32.mxu0 %v3768_v42 }
  0x73   : > { %1078 = vmatmul.mubr.f32.gmra.mxu1 %v3952_v56  ;;  %1169 = vmatmul.mubr.f32.vlgmr.msra.gmra.mxu0 %v4017_v23 }
  0x74   : > { %1261 = vmatprep.subr.mxu1 %v1260_v33  ;;  %1083 = vmatprep.mubr.f32.mxu1 %v3768_v42 }
  0x75   : > { %1267 = vmatpush1.msra.mxu1 %v1266_v38  ;;  %1174 = vmatprep.mubr.f32.mxu0 %v3768_v42 }
  0x76   : > { %1273 = vmatprep.subr.mxu1 %v1272_v10  ;;  %1367 = vmatprep.subr.mxu0 %v4165_v43  ;;  %v3556_v43 = vld [vmem:[%s3946_s6 + $0xc0] sm:$0xff] }
  0x77   : > { %1085 = vmatmul.mubr.f32.gmra.mxu1 %v4066_v46  ;;  %1180 = vmatmul.mubr.f32.gmra.mxu0 %v4054_v40 }
  0x78   : > { %1279 = vmatpush1.msra.mxu1 %v1278_v12  ;;  %1185 = vmatprep.mubr.f32.mxu0 %v3768_v42 }
  0x79   : > { %1312 = vmatprep.mubr.f32.mxu1 %v3768_v42  ;;  %1370 = vmatpush1.msra.mxu0 %v4174_v0  ;;  %v4354_v0 = vand.u32 4294901760, %v3556_v43 }
  0x7a   : > { %1479 = vmatprep.subr.mxu1 %v4145_v36  ;;  %1373 = vmatprep.subr.mxu0 %v4187_v19  ;;  %v4365_v19 = vsub.f32 %v3557_v52, %v4344_v2 }
  0x7b   : > { %1191 = vmatmul.mubr.f32.gmra.mxu0 %v4095_v62  ;;  %1314 = vmatmul.mubr.f32.vlgmr.msra.gmra.mxu1 %v3935_v47 }
  0x7c   : > { %1481 = vmatpush1.msra.mxu1 %v4153_v39  ;;  %1196 = vmatprep.mubr.f32.mxu0 %v3768_v42 }
  0x7d   : > { %1319 = vmatprep.mubr.f32.mxu1 %v3768_v42  ;;  %1376 = vmatpush1.msra.mxu0 %v4198_v59 }
  0x7e   : > { %1379 = vmatprep.subr.mxu0 %v4228_v53  ;;  %1483 = vmatprep.subr.mxu1 %v4167_v51  ;;  %v2065_v53 = vand.u32 4294901760, %v4365_v19 }
  0x7f   : > { %1202 = vmatmul.mubr.f32.gmra.mxu0 %v4102_v5  ;;  %1321 = vmatmul.mubr.f32.gmra.mxu1 %v3937_v48 }
  0x80   : > { %1382 = vmatpush1.msra.mxu0 %v4233_v55  ;;  %1485 = vmatpush1.msra.mxu1 %v4176_v11 }
  0x81   : > { %1385 = vmatprep.subr.mxu0 %v4241_v58  ;;  %1326 = vmatprep.mubr.f32.mxu1 %v3768_v42 }
  0x82   : > { %1388 = vmatpush1.msra.mxu0 %v4251_v50  ;;  %1421 = vmatprep.mubr.f32.mxu0 %v3768_v42  ;;  %v2066_v50 = vsub.f32 %v4365_v19, %v2065_v53 }
  0x83   : > { %1328 = vmatmul.mubr.f32.gmra.mxu1 %v3952_v56  ;;  %1424 = vmatmul.mubr.f32.vlgmr.msra.gmra.mxu0 %v3962_v63 }
  0x84   : > { %1487 = vmatprep.subr.mxu1 %v4200_v16  ;;  %1333 = vmatprep.mubr.f32.mxu1 %v3768_v42 }
  0x85   : > { %1489 = vmatpush1.msra.mxu1 %v4205_v21  ;;  %1429 = vmatprep.mubr.f32.mxu0 %v3768_v42 }
  0x86   : > { %1491 = vmatprep.subr.mxu1 %v4215_v26  ;;  %1590 = vmatprep.subr.mxu0 %v1234_v1  ;;  %v4342_v1 = vsub.f32 %v4113_v27, %v4323_v20  ;;  %v3553_v27 = vld [vmem:[%s3946_s6 + $0xa8] sm:$0xff] }
  0x87   : > { %1335 = vmatmul.mubr.f32.gmra.mxu1 %v4066_v46  ;;  %1432 = vmatmul.mubr.f32.gmra.mxu0 %v4000_v15 }
  0x88   : > { %1493 = vmatpush1.msra.mxu1 %v4225_v44  ;;  %1437 = vmatprep.mubr.f32.mxu0 %v3768_v42 }
  0x89   : > { %1526 = vmatprep.mubr.f32.mxu1 %v3768_v42  ;;  %1594 = vmatpush1.msra.mxu0 %v1240_v13  ;;  %v3549_v13 = vld [vmem:[%s3946_s6 + $0x88] sm:$0xff] }
  0x8a   : > { %1705 = vmatprep.subr.mxu1 %v4145_v36  ;;  %1598 = vmatprep.subr.mxu0 %v1246_v17  ;;  %v4352_v36 = vsub.f32 %v4120_v28, %v4331_v25  ;;  %v3552_v28 = vld [vmem:[%s3946_s6 + $0xa0] sm:$0xff]  ;;  %v4378_v17 = vand.u32 4294901760, %v3553_v27  ;;  %v4393_v55 = vand.u32 4294901760, %v3549_v13 }
  0x8b   : > { %1440 = vmatmul.mubr.f32.gmra.mxu0 %v4063_v45  ;;  %1530 = vmatmul.mubr.f32.vlgmr.msra.gmra.mxu1 %v3981_v9  ;;  %v4383_v35 = vand.u32 4294901760, %v3552_v28 }
  0x8c   : > { %1707 = vmatpush1.msra.mxu1 %v4153_v39  ;;  %1445 = vmatprep.mubr.f32.mxu0 %v3768_v42  ;;  %v2053_v39 = vand.u32 4294901760, %v4342_v1  ;;  %v2059_v59 = vand.u32 4294901760, %v4352_v36  ;;  %v4406_v6 = vsub.f32 %v3553_v27, %v4378_v17  ;;  %v3559_v27 = vld [vmem:[%s3946_s6 + $0xd8] sm:$0xff] }
  0x8d   : > { %1535 = vmatprep.mubr.f32.mxu1 %v3768_v42  ;;  %1602 = vmatpush1.msra.mxu0 %v1252_v41  ;;  %v3548_v41 = vld [vmem:[%s3946_s6 + $0x80] sm:$0xff]  ;;  %v4411_v7 = vsub.f32 %v3552_v28, %v4383_v35  ;;  %v4509_v28 = vand.u32 4294901760, %v4160_v18 }
  0x8e   : > { %1606 = vmatprep.subr.mxu0 %v1258_v61  ;;  %1709 = vmatprep.subr.mxu1 %v4167_v51  ;;  %v4376_v51 = vsub.f32 %v3556_v43, %v4354_v0  ;;  %v2060_v3 = vsub.f32 %v4352_v36, %v2059_v59  ;;  %v4403_v58 = vand.u32 4294901760, %v3548_v41  ;;  %v4419_v61 = vsub.f32 %v3549_v13, %v4393_v55 }
  0x8f   : > { %1448 = vmatmul.mubr.f32.gmra.mxu0 %v4079_v49  ;;  %1539 = vmatmul.mubr.f32.gmra.mxu1 %v4020_v24  ;;  %v2077_v8 = vand.u32 4294901760, %v4406_v6  ;;  %v4501_v43 = vand.u32 4294901760, %v4140_v34  ;;  %v4522_v13 = vand.u32 4294901760, %v3559_v27 }
  0x90   : > { %1610 = vmatpush1.msra.mxu0 %v1264_v4  ;;  %1711 = vmatpush1.msra.mxu1 %v4176_v11  ;;  %v2054_v11 = vsub.f32 %v4342_v1, %v2053_v39  ;;  %v2071_v57 = vand.u32 4294901760, %v4376_v51  ;;  %v4429_v4 = vsub.f32 %v3548_v41, %v4403_v58  ;;  %v2089_v22 = vand.u32 4294901760, %v4419_v61 }
  0x91   : > { %1614 = vmatprep.subr.mxu0 %v1270_v14  ;;  %1544 = vmatprep.mubr.f32.mxu1 %v3768_v42  ;;  %v2083_v14 = vand.u32 4294901760, %v4411_v7 }
  0x92   : > { %1618 = vmatpush1.msra.mxu0 %v1276_v30  ;;  %1651 = vmatprep.mubr.f32.mxu0 %v3768_v42  ;;  %v2078_v30 = vsub.f32 %v4406_v6, %v2077_v8  ;;  %v2095_v31 = vand.u32 4294901760, %v4429_v4  ;;  %v2090_v33 = vsub.f32 %v4419_v61, %v2089_v22 }
  0x93   : > { %1548 = vmatmul.mubr.f32.gmra.mxu1 %v4075_v54  ;;  %1653 = vmatmul.mubr.f32.vlgmr.msra.gmra.mxu0 %v3935_v47  ;;  %v2084_v32 = vsub.f32 %v4411_v7, %v2083_v14 }
  0x94   : > { %1713 = vmatprep.subr.mxu1 %v4200_v16  ;;  %1553 = vmatprep.mubr.f32.mxu1 %v3768_v42  ;;  %v2055_v16 = vand.u32 4294901760, %v2054_v11  ;;  %v2079_v37 = vand.u32 4294901760, %v2078_v30  ;;  %v2096_v38 = vsub.f32 %v4429_v4, %v2095_v31  ;;  %v2091_v12 = vand.u32 4294901760, %v2090_v33 }
  0x95   : > { %1715 = vmatpush1.msra.mxu1 %v4205_v21  ;;  %1658 = vmatprep.mubr.f32.mxu0 %v3768_v42  ;;  %v2061_v21 = vand.u32 4294901760, %v2060_v3  ;;  %v2085_v10 = vand.u32 4294901760, %v2084_v32 }
  0x96   : > { %1717 = vmatprep.subr.mxu1 %v4215_v26  ;;  %1935 = vmatprep.subr.mxu0 %v4323_v20  ;;  %v2072_v26 = vsub.f32 %v4376_v51, %v2071_v57  ;;  %v2097_v52 = vand.u32 4294901760, %v2096_v38 }
  0x97   : > { %1557 = vmatmul.mubr.f32.gmra.mxu1 %v4089_v60  ;;  %1660 = vmatmul.mubr.f32.gmra.mxu0 %v3937_v48 }
  0x98   : > { %1719 = vmatpush1.msra.mxu1 %v4225_v44  ;;  %1665 = vmatprep.mubr.f32.mxu0 %v3768_v42  ;;  %v2067_v44 = vand.u32 4294901760, %v2066_v50  ;;  %v2073_v29 = vand.u32 4294901760, %v2072_v26 }
  0x99   : > { %1752 = vmatprep.mubr.f32.mxu1 %v3768_v42  ;;  %1937 = vmatpush1.msra.mxu0 %v4331_v25 }
  0x9a   : > { %2056 = vmatprep.subr.mxu1 %v2055_v16  ;;  %1939 = vmatprep.subr.mxu0 %v4344_v2 }
  0x9b   : > { %1667 = vmatmul.mubr.f32.gmra.mxu0 %v3952_v56  ;;  %1754 = vmatmul.mubr.f32.vlgmr.msra.gmra.mxu1 %v3935_v47 }
  0x9c   : > { %2062 = vmatpush1.msra.mxu1 %v2061_v21  ;;  %1672 = vmatprep.mubr.f32.mxu0 %v3768_v42 }
  0x9d   : > { %1759 = vmatprep.mubr.f32.mxu1 %v3768_v42  ;;  %1941 = vmatpush1.msra.mxu0 %v4354_v0 }
  0x9e   : > { %1943 = vmatprep.subr.mxu0 %v4378_v17  ;;  %2068 = vmatprep.subr.mxu1 %v2067_v44 }
  0x9f   : > { %1674 = vmatmul.mubr.f32.gmra.mxu0 %v4066_v46  ;;  %1761 = vmatmul.mubr.f32.gmra.mxu1 %v3937_v48 }
  0xa0   : > { %1945 = vmatpush1.msra.mxu0 %v4383_v35  ;;  %2074 = vmatpush1.msra.mxu1 %v2073_v29 }
  0xa1   : > { %1947 = vmatprep.subr.mxu0 %v4393_v55  ;;  %1766 = vmatprep.mubr.f32.mxu1 %v3768_v42 }
  0xa2   : > { %1949 = vmatpush1.msra.mxu0 %v4403_v58  ;;  %1982 = vmatprep.mubr.f32.mxu0 %v3768_v42 }
  0xa3   : > { %1768 = vmatmul.mubr.f32.gmra.mxu1 %v3952_v56  ;;  %1988 = vmatmul.mubr.f32.vlgmr.msra.gmra.mxu0 %v4017_v23 }
  0xa4   : > { %2080 = vmatprep.subr.mxu1 %v2079_v37  ;;  %1773 = vmatprep.mubr.f32.mxu1 %v3768_v42 }
  0xa5   : > { %2086 = vmatpush1.msra.mxu1 %v2085_v10  ;;  %1993 = vmatprep.mubr.f32.mxu0 %v3768_v42 }
  0xa6   : > { %2092 = vmatprep.subr.mxu1 %v2091_v12  ;;  %2186 = vmatprep.subr.mxu0 %v4342_v1  ;;  %v3558_v1 = vld [vmem:[%s3946_s6 + $0xd0] sm:$0xff] }
  0xa7   : > { %1775 = vmatmul.mubr.f32.gmra.mxu1 %v4066_v46  ;;  %1999 = vmatmul.mubr.f32.gmra.mxu0 %v4054_v40 }
  0xa8   : > { %2098 = vmatpush1.msra.mxu1 %v2097_v52  ;;  %2004 = vmatprep.mubr.f32.mxu0 %v3768_v42 }
  0xa9   : > { %2131 = vmatprep.mubr.f32.mxu1 %v3768_v42  ;;  %2189 = vmatpush1.msra.mxu0 %v4352_v36  ;;  %v4532_v36 = vand.u32 4294901760, %v3558_v1 }
  0xaa   : > { %2298 = vmatprep.subr.mxu1 %v4323_v20  ;;  %2192 = vmatprep.subr.mxu0 %v4365_v19  ;;  %v4543_v19 = vsub.f32 %v3559_v27, %v4522_v13 }
  0xab   : > { %2010 = vmatmul.mubr.f32.gmra.mxu0 %v4095_v62  ;;  %2133 = vmatmul.mubr.f32.vlgmr.msra.gmra.mxu1 %v3935_v47 }
  0xac   : > { %2300 = vmatpush1.msra.mxu1 %v4331_v25  ;;  %2015 = vmatprep.mubr.f32.mxu0 %v3768_v42  ;;  %v2755_v3 = vand.u32 4294901760, %v4543_v19 }
  0xad   : > { %2138 = vmatprep.mubr.f32.mxu1 %v3768_v42  ;;  %2195 = vmatpush1.msra.mxu0 %v4376_v51 }
  0xae   : > { %2198 = vmatprep.subr.mxu0 %v4406_v6  ;;  %2302 = vmatprep.subr.mxu1 %v4344_v2  ;;  %v2756_v21 = vsub.f32 %v4543_v19, %v2755_v3 }
  0xaf   : > { %2021 = vmatmul.mubr.f32.gmra.mxu0 %v4102_v5  ;;  %2140 = vmatmul.mubr.f32.gmra.mxu1 %v3937_v48 }
  0xb0   : > { %2201 = vmatpush1.msra.mxu0 %v4411_v7  ;;  %2304 = vmatpush1.msra.mxu1 %v4354_v0 }
  0xb1   : > { %2204 = vmatprep.subr.mxu0 %v4419_v61  ;;  %2145 = vmatprep.mubr.f32.mxu1 %v3768_v42 }
  0xb2   : > { %2207 = vmatpush1.msra.mxu0 %v4429_v4  ;;  %2240 = vmatprep.mubr.f32.mxu0 %v3768_v42 }
  0xb3   : > { %2147 = vmatmul.mubr.f32.gmra.mxu1 %v3952_v56  ;;  %2243 = vmatmul.mubr.f32.vlgmr.msra.gmra.mxu0 %v3962_v63 }
  0xb4   : > { %2306 = vmatprep.subr.mxu1 %v4378_v17  ;;  %2152 = vmatprep.mubr.f32.mxu1 %v3768_v42 }
  0xb5   : > { %2308 = vmatpush1.msra.mxu1 %v4383_v35  ;;  %2248 = vmatprep.mubr.f32.mxu0 %v3768_v42 }
  0xb6   : > { %2310 = vmatprep.subr.mxu1 %v4393_v55  ;;  %2409 = vmatprep.subr.mxu0 %v2053_v39  ;;  %v4520_v39 = vsub.f32 %v4140_v34, %v4501_v43  ;;  %v3555_v34 = vld [vmem:[%s3946_s6 + $0xb8] sm:$0xff] }
  0xb7   : > { %2154 = vmatmul.mubr.f32.gmra.mxu1 %v4066_v46  ;;  %2251 = vmatmul.mubr.f32.gmra.mxu0 %v4000_v15  ;;  %v4556_v41 = vand.u32 4294901760, %v3555_v34 }
  0xb8   : > { %2312 = vmatpush1.msra.mxu1 %v4403_v58  ;;  %2256 = vmatprep.mubr.f32.mxu0 %v3768_v42 }
  0xb9   : > { %2345 = vmatprep.mubr.f32.mxu1 %v3768_v42  ;;  %2413 = vmatpush1.msra.mxu0 %v2059_v59  ;;  %v3551_v59 = vld [vmem:[%s3946_s6 + $0x98] sm:$0xff]  ;;  %v4584_v50 = vsub.f32 %v3555_v34, %v4556_v41 }
  0xba   : > { %2524 = vmatprep.subr.mxu1 %v4323_v20  ;;  %2417 = vmatprep.subr.mxu0 %v2065_v53  ;;  %v4530_v20 = vsub.f32 %v4160_v18, %v4509_v28  ;;  %v3554_v18 = vld [vmem:[%s3946_s6 + $0xb0] sm:$0xff] }
  0xbb   : > { %2259 = vmatmul.mubr.f32.gmra.mxu0 %v4063_v45  ;;  %2349 = vmatmul.mubr.f32.vlgmr.msra.gmra.mxu1 %v3981_v9  ;;  %v4561_v11 = vand.u32 4294901760, %v3554_v18  ;;  %v3550_v53 = vld [vmem:[%s3946_s6 + $0x90] sm:$0xff] }
  0xbc   : > { %2526 = vmatpush1.msra.mxu1 %v4331_v25  ;;  %2264 = vmatprep.mubr.f32.mxu0 %v3768_v42  ;;  %v2743_v25 = vand.u32 4294901760, %v4520_v39  ;;  %v2749_v51 = vand.u32 4294901760, %v4530_v20  ;;  %v4581_v16 = vand.u32 4294901760, %v3550_v53 }
  0xbd   : > { %2354 = vmatprep.mubr.f32.mxu1 %v3768_v42  ;;  %2421 = vmatpush1.msra.mxu0 %v2071_v57  ;;  %v4571_v57 = vand.u32 4294901760, %v3551_v59  ;;  %v4589_v61 = vsub.f32 %v3554_v18, %v4561_v11 }
  0xbe   : > { %2425 = vmatprep.subr.mxu0 %v2077_v8  ;;  %2528 = vmatprep.subr.mxu1 %v4344_v2  ;;  %v4554_v2 = vsub.f32 %v3558_v1, %v4532_v36  ;;  %v2750_v6 = vsub.f32 %v4530_v20, %v2749_v51  ;;  %v4607_v4 = vsub.f32 %v3550_v53, %v4581_v16  ;;  %v2767_v8 = vand.u32 4294901760, %v4584_v50 }
  0xbf   : > { %2267 = vmatmul.mubr.f32.gmra.mxu0 %v4079_v49  ;;  %2358 = vmatmul.mubr.f32.gmra.mxu1 %v4020_v24  ;;  %v4597_v26 = vsub.f32 %v3551_v59, %v4571_v57 }
  0xc0   : > { %2429 = vmatpush1.msra.mxu0 %v2083_v14  ;;  %2530 = vmatpush1.msra.mxu1 %v4354_v0  ;;  %v2744_v0 = vsub.f32 %v4520_v39, %v2743_v25  ;;  %v2761_v7 = vand.u32 4294901760, %v4554_v2  ;;  %v2773_v14 = vand.u32 4294901760, %v4589_v61  ;;  %v2768_v29 = vsub.f32 %v4584_v50, %v2767_v8 }
  0xc1   : > { %2433 = vmatprep.subr.mxu0 %v2089_v22  ;;  %2363 = vmatprep.mubr.f32.mxu1 %v3768_v42  ;;  %v2779_v44 = vand.u32 4294901760, %v4597_v26  ;;  %v2785_v30 = vand.u32 4294901760, %v4607_v4 }
  0xc2   : > { %2437 = vmatpush1.msra.mxu0 %v2095_v31  ;;  %2470 = vmatprep.mubr.f32.mxu0 %v3768_v42  ;;  %v2774_v31 = vsub.f32 %v4589_v61, %v2773_v14  ;;  %v2769_v33 = vand.u32 4294901760, %v2768_v29 }
  0xc3   : > { %2367 = vmatmul.mubr.f32.gmra.mxu1 %v4075_v54  ;;  %2472 = vmatmul.mubr.f32.vlgmr.msra.gmra.mxu0 %v3935_v47  ;;  %v2780_v32 = vsub.f32 %v4597_v26, %v2779_v44  ;;  %v2786_v37 = vsub.f32 %v4607_v4, %v2785_v30 }
  0xc4   : > { %2532 = vmatprep.subr.mxu1 %v4378_v17  ;;  %2372 = vmatprep.mubr.f32.mxu1 %v3768_v42  ;;  %v2745_v17 = vand.u32 4294901760, %v2744_v0  ;;  %v2775_v38 = vand.u32 4294901760, %v2774_v31 }
  0xc5   : > { %2534 = vmatpush1.msra.mxu1 %v4383_v35  ;;  %2477 = vmatprep.mubr.f32.mxu0 %v3768_v42  ;;  %v2751_v35 = vand.u32 4294901760, %v2750_v6  ;;  %v2781_v10 = vand.u32 4294901760, %v2780_v32  ;;  %v2787_v12 = vand.u32 4294901760, %v2786_v37 }
  0xc6   : > { %2536 = vmatprep.subr.mxu1 %v4393_v55  ;;  %2625 = vmatprep.subr.mxu0 %v4501_v43  ;;  %v2762_v55 = vsub.f32 %v4554_v2, %v2761_v7 }
  0xc7   : > { %2376 = vmatmul.mubr.f32.gmra.mxu1 %v4089_v60  ;;  %2479 = vmatmul.mubr.f32.gmra.mxu0 %v3937_v48 }
  0xc8   : > { %2538 = vmatpush1.msra.mxu1 %v4403_v58  ;;  %2484 = vmatprep.mubr.f32.mxu0 %v3768_v42  ;;  %v2757_v58 = vand.u32 4294901760, %v2756_v21  ;;  %v2763_v22 = vand.u32 4294901760, %v2762_v55 }
  0xc9   : > { %2571 = vmatprep.mubr.f32.mxu1 %v3768_v42  ;;  %2627 = vmatpush1.msra.mxu0 %v4509_v28 }
  0xca   : > { %2746 = vmatprep.subr.mxu1 %v2745_v17  ;;  %2629 = vmatprep.subr.mxu0 %v4522_v13 }
  0xcb   : > { %2486 = vmatmul.mubr.f32.gmra.mxu0 %v3952_v56  ;;  %2573 = vmatmul.mubr.f32.vlgmr.msra.gmra.mxu1 %v3935_v47 }
  0xcc   : > { %2752 = vmatpush1.msra.mxu1 %v2751_v35  ;;  %2491 = vmatprep.mubr.f32.mxu0 %v3768_v42 }
  0xcd   : > { %2578 = vmatprep.mubr.f32.mxu1 %v3768_v42  ;;  %2631 = vmatpush1.msra.mxu0 %v4532_v36 }
  0xce   : > { %2633 = vmatprep.subr.mxu0 %v4556_v41  ;;  %2758 = vmatprep.subr.mxu1 %v2757_v58 }
  0xcf   : > { %2493 = vmatmul.mubr.f32.gmra.mxu0 %v4066_v46  ;;  %2580 = vmatmul.mubr.f32.gmra.mxu1 %v3937_v48 }
  0xd0   : > { %2635 = vmatpush1.msra.mxu0 %v4561_v11  ;;  %2764 = vmatpush1.msra.mxu1 %v2763_v22 }
  0xd1   : > { %2637 = vmatprep.subr.mxu0 %v4571_v57  ;;  %2585 = vmatprep.mubr.f32.mxu1 %v3768_v42 }
  0xd2   : > { %2639 = vmatpush1.msra.mxu0 %v4581_v16  ;;  %2672 = vmatprep.mubr.f32.mxu0 %v3768_v42 }
  0xd3   : > { %2587 = vmatmul.mubr.f32.gmra.mxu1 %v3952_v56  ;;  %2678 = vmatmul.mubr.f32.vlgmr.msra.gmra.mxu0 %v4017_v23 }
  0xd4   : > { %2770 = vmatprep.subr.mxu1 %v2769_v33  ;;  %2592 = vmatprep.mubr.f32.mxu1 %v3768_v42 }
  0xd5   : > { %2776 = vmatpush1.msra.mxu1 %v2775_v38  ;;  %2683 = vmatprep.mubr.f32.mxu0 %v3768_v42 }
  0xd6   : > { %2782 = vmatprep.subr.mxu1 %v2781_v10  ;;  %2876 = vmatprep.subr.mxu0 %v4520_v39 }
  0xd7   : > { %2594 = vmatmul.mubr.f32.gmra.mxu1 %v4066_v46  ;;  %2689 = vmatmul.mubr.f32.gmra.mxu0 %v4054_v40 }
  0xd8   : > { %2788 = vmatpush1.msra.mxu1 %v2787_v12  ;;  %2694 = vmatprep.mubr.f32.mxu0 %v3768_v42 }
  0xd9   : > { %2821 = vmatprep.mubr.f32.mxu1 %v3768_v42  ;;  %2879 = vmatpush1.msra.mxu0 %v4530_v20 }
  0xda   : > { %2988 = vmatprep.subr.mxu1 %v4501_v43  ;;  %2882 = vmatprep.subr.mxu0 %v4543_v19 }
  0xdb   : > { %2700 = vmatmul.mubr.f32.gmra.mxu0 %v4095_v62  ;;  %2823 = vmatmul.mubr.f32.vlgmr.msra.gmra.mxu1 %v3935_v47 }
  0xdc   : > { %2990 = vmatpush1.msra.mxu1 %v4509_v28  ;;  %2705 = vmatprep.mubr.f32.mxu0 %v3768_v42 }
  0xdd   : > { %2828 = vmatprep.mubr.f32.mxu1 %v3768_v42  ;;  %2885 = vmatpush1.msra.mxu0 %v4554_v2 }
  0xde   : > { %2888 = vmatprep.subr.mxu0 %v4584_v50  ;;  %2992 = vmatprep.subr.mxu1 %v4522_v13 }
  0xdf   : > { %2711 = vmatmul.mubr.f32.gmra.mxu0 %v4102_v5  ;;  %2830 = vmatmul.mubr.f32.gmra.mxu1 %v3937_v48 }
  0xe0   : > { %2891 = vmatpush1.msra.mxu0 %v4589_v61  ;;  %2994 = vmatpush1.msra.mxu1 %v4532_v36 }
  0xe1   : > { %2894 = vmatprep.subr.mxu0 %v4597_v26  ;;  %2835 = vmatprep.mubr.f32.mxu1 %v3768_v42 }
  0xe2   : > { %2897 = vmatpush1.msra.mxu0 %v4607_v4  ;;  %2930 = vmatprep.mubr.f32.mxu0 %v3768_v42 }
  0xe3   : > { %2837 = vmatmul.mubr.f32.gmra.mxu1 %v3952_v56  ;;  %2933 = vmatmul.mubr.f32.vlgmr.msra.gmra.mxu0 %v3962_v63 }
  0xe4   : > { %2996 = vmatprep.subr.mxu1 %v4556_v41  ;;  %2842 = vmatprep.mubr.f32.mxu1 %v3768_v42 }
  0xe5   : > { %2998 = vmatpush1.msra.mxu1 %v4561_v11  ;;  %2938 = vmatprep.mubr.f32.mxu0 %v3768_v42 }
  0xe6   : > { %3000 = vmatprep.subr.mxu1 %v4571_v57  ;;  %3099 = vmatprep.subr.mxu0 %v2743_v25 }
  0xe7   : > { %2844 = vmatmul.mubr.f32.gmra.mxu1 %v4066_v46  ;;  %2941 = vmatmul.mubr.f32.gmra.mxu0 %v4000_v15 }
  0xe8   : > { %3002 = vmatpush1.msra.mxu1 %v4581_v16  ;;  %2946 = vmatprep.mubr.f32.mxu0 %v3768_v42 }
  0xe9   : > { %3035 = vmatprep.mubr.f32.mxu1 %v3768_v42  ;;  %3103 = vmatpush1.msra.mxu0 %v2749_v51 }
  0xea   : > { %3214 = vmatprep.subr.mxu1 %v4501_v43  ;;  %3107 = vmatprep.subr.mxu0 %v2755_v3 }
  0xeb   : > { %2949 = vmatmul.mubr.f32.gmra.mxu0 %v4063_v45  ;;  %3039 = vmatmul.mubr.f32.vlgmr.msra.gmra.mxu1 %v3981_v9  ;;  %v4729_v9 = vpop.permute.xlu0 %357 }
  0xec   : > { %3216 = vmatpush1.msra.mxu1 %v4509_v28  ;;  %2954 = vmatprep.mubr.f32.mxu0 %v3768_v42 }
  0xed   : > { %3044 = vmatprep.mubr.f32.mxu1 %v3768_v42  ;;  %3111 = vmatpush1.msra.mxu0 %v2761_v7 }
  0xee   : > { %3115 = vmatprep.subr.mxu0 %v2767_v8  ;;  %3218 = vmatprep.subr.mxu1 %v4522_v13 }
  0xef   : > { %2957 = vmatmul.mubr.f32.gmra.mxu0 %v4079_v49  ;;  %3048 = vmatmul.mubr.f32.gmra.mxu1 %v4020_v24  ;;  %v4734_v40 = vpop.permute.xlu0 %362 }
  0xf0   : > { %3119 = vmatpush1.msra.mxu0 %v2773_v14  ;;  %3220 = vmatpush1.msra.mxu1 %v4532_v36 }
  0xf1   : > { %3123 = vmatprep.subr.mxu0 %v2779_v44  ;;  %3053 = vmatprep.mubr.f32.mxu1 %v3768_v42 }
  0xf2   : > { %3127 = vmatpush1.msra.mxu0 %v2785_v30  ;;  %3160 = vmatprep.mubr.f32.mxu0 %v3768_v42 }
  0xf3   : > { %3057 = vmatmul.mubr.f32.gmra.mxu1 %v4075_v54  ;;  %3162 = vmatmul.mubr.f32.vlgmr.msra.gmra.mxu0 %v3935_v47  ;;  %v4736_v54 = vpop.permute.xlu1 %367 }
  0xf4   : > { %3222 = vmatprep.subr.mxu1 %v4556_v41  ;;  %3062 = vmatprep.mubr.f32.mxu1 %v3768_v42 }
  0xf5   : > { %3224 = vmatpush1.msra.mxu1 %v4561_v11  ;;  %3167 = vmatprep.mubr.f32.mxu0 %v3768_v42 }
  0xf6   : > { %3226 = vmatprep.subr.mxu1 %v4571_v57 }
  0xf7   : > { %3066 = vmatmul.mubr.f32.gmra.mxu1 %v4089_v60  ;;  %3169 = vmatmul.mubr.f32.gmra.mxu0 %v3937_v48  ;;  %v4742_v13 = vpop.permute.xlu1 %372 }
  0xf8   : > { %3228 = vmatpush1.msra.mxu1 %v4581_v16  ;;  %3174 = vmatprep.mubr.f32.mxu0 %v3768_v42 }
  0xf9   : > { %3261 = vmatprep.mubr.f32.mxu1 %v3768_v42 }
  0xfb   : > { %3176 = vmatmul.mubr.f32.gmra.mxu0 %v3952_v56  ;;  %3263 = vmatmul.mubr.f32.vlgmr.msra.gmra.mxu1 %v3935_v47 }
  0xfc   : > { %3181 = vmatprep.mubr.f32.mxu0 %v3768_v42  ;;  %3268 = vmatprep.mubr.f32.mxu1 %v3768_v42 }
  0xff   : > { %3183 = vmatmul.mubr.f32.gmra.mxu0 %v4066_v46  ;;  %3270 = vmatmul.mubr.f32.gmra.mxu1 %v3937_v48 }
 0x100   : > { %3275 = vmatprep.mubr.f32.mxu1 %v3768_v42 }
 0x102   : > { %v480_v63 = vpop.f32.mrf.mxu0 }
 0x103   : > { %3277 = vmatmul.mubr.f32.gmra.mxu1 %v3952_v56  ;;  %v481_v24 = vadd.f32 %v480_v63, %v4729_v9 }
 0x104   : > { %v482_v15 = vpop.f32.mrf.mxu0  ;;  %3282 = vmatprep.mubr.f32.mxu1 %v3768_v42 }
 0x105   : > { %v483_v56 = vadd.f32 %v482_v15, %v4729_v9 }
 0x106   : > { %v491_v23 = vpop.f32.mrf.mxu0 }
 0x107   : > { %3284 = vmatmul.mubr.f32.gmra.mxu1 %v4066_v46  ;;  %v492_v62 = vadd.f32 %v491_v23, %v4734_v40 }
 0x108   : > { %v493_v47 = vpop.f32.mrf.mxu0 }
 0x109   : > { %v494_v28 = vadd.f32 %v493_v47, %v4734_v40 }
 0x10a   : > { %v502_v45 = vpop.f32.mrf.mxu0 }
 0x10b   : > { %v625_v48 = vpop.f32.mrf.mxu1  ;;  %v503_v1 = vadd.f32 %v502_v45, %v4736_v54 }
 0x10c   : > { %v626_v49 = vadd.f32 %v625_v48, %v481_v24  ;;  %v504_v60 = vpop.f32.mrf.mxu0 }
 0x10d   : > { %v627_v5 = vpop.f32.mrf.mxu1  ;;  %v505_v18 = vadd.f32 %v504_v60, %v4736_v54 }
 0x10e   : > { %v628_v42 = vadd.f32 %v627_v5, %v483_v56  ;;  %v513_v52 = vpop.f32.mrf.mxu0 }
 0x10f   : > { %v632_v43 = vpop.f32.mrf.mxu1  ;;  %v514_v59 = vadd.f32 %v513_v52, %v4742_v13 }
 0x110   : > { %v633_v46 = vadd.f32 %v632_v43, %v492_v62  ;;  %v515_v27 = vpop.f32.mrf.mxu0 }
 0x111   : > { %v634_v39 = vpop.f32.mrf.mxu1  ;;  %v516_v6 = vadd.f32 %v515_v27, %v4742_v13 }
 0x112   : > { %v635_v20 = vadd.f32 %v634_v39, %v494_v28 }
 0x113   : > { %v639_v36 = vpop.f32.mrf.mxu1  ;;  %v735_v34 = vpop.f32.mrf.mxu0 }
 0x114   : > { %v640_v25 = vadd.f32 %v639_v36, %v503_v1  ;;  %v736_v19 = vadd.f32 %v735_v34, %v626_v49 }
 0x115   : > { %v641_v51 = vpop.f32.mrf.mxu1  ;;  %v737_v2 = vpop.f32.mrf.mxu0 }
 0x116   : > { %v642_v41 = vadd.f32 %v641_v51, %v505_v18  ;;  %v738_v11 = vadd.f32 %v737_v2, %v628_v42 }
 0x117   : > { %v646_v53 = vpop.f32.mrf.mxu1  ;;  %v743_v0 = vpop.f32.mrf.mxu0 }
 0x118   : > { %v647_v3 = vadd.f32 %v646_v53, %v514_v59  ;;  %v744_v57 = vadd.f32 %v743_v0, %v633_v46 }
 0x119   : > { %v648_v7 = vpop.f32.mrf.mxu1  ;;  %v745_v16 = vpop.f32.mrf.mxu0 }
 0x11a   : > { %v649_v50 = vadd.f32 %v648_v7, %v516_v6  ;;  %v746_v61 = vadd.f32 %v745_v16, %v635_v20 }
 0x11b   : > { %v751_v17 = vpop.f32.mrf.mxu0  ;;  %v841_v21 = vpop.f32.mrf.mxu1 }
 0x11c   : > { %v752_v26 = vadd.f32 %v751_v17, %v640_v25  ;;  %v842_v35 = vadd.f32 %v841_v21, %v736_v19 }
 0x11d   : > { %v753_v55 = vpop.f32.mrf.mxu0  ;;  %v843_v4 = vpop.f32.mrf.mxu1 }
 0x11e   : > { %v754_v8 = vadd.f32 %v753_v55, %v642_v41  ;;  %v844_v14 = vadd.f32 %v843_v4, %v738_v11 }
 0x11f   : > { %v759_v58 = vpop.f32.mrf.mxu0  ;;  %v850_v44 = vpop.f32.mrf.mxu1 }
 0x120   : > { %v760_v22 = vadd.f32 %v759_v58, %v647_v3  ;;  %v851_v29 = vadd.f32 %v850_v44, %v744_v57 }
 0x121   : > { %v761_v30 = vpop.f32.mrf.mxu0  ;;  %v852_v31 = vpop.f32.mrf.mxu1 }
 0x122   : > { %v762_v32 = vadd.f32 %v761_v30, %v649_v50  ;;  %v853_v33 = vadd.f32 %v852_v31, %v746_v61 }
 0x123   : > { %v859_v37 = vpop.f32.mrf.mxu1  ;;  %v964_v38 = vpop.f32.mrf.mxu0 }
 0x124   : > { %v860_v10 = vadd.f32 %v859_v37, %v752_v26  ;;  %v965_v12 = vadd.f32 %v964_v38, %v842_v35 }
 0x125   : > { %v861_v63 = vpop.f32.mrf.mxu1  ;;  %v966_v15 = vpop.f32.mrf.mxu0 }
 0x126   : > { %v862_v23 = vadd.f32 %v861_v63, %v754_v8  ;;  %v967_v47 = vadd.f32 %v966_v15, %v844_v14 }
 0x127   : > { %v868_v24 = vpop.f32.mrf.mxu1  ;;  %v971_v45 = vpop.f32.mrf.mxu0 }
 0x128   : > { %v869_v48 = vadd.f32 %v868_v24, %v760_v22  ;;  %v972_v49 = vadd.f32 %v971_v45, %v851_v29 }
 0x129   : > { %v870_v60 = vpop.f32.mrf.mxu1  ;;  %v973_v56 = vpop.f32.mrf.mxu0 }
 0x12a   : > { %v871_v62 = vadd.f32 %v870_v60, %v762_v32  ;;  %v974_v5 = vadd.f32 %v973_v56, %v853_v33 }
 0x12b   : > { %v978_v42 = vpop.f32.mrf.mxu0  ;;  %v1065_v52 = vpop.f32.mrf.mxu1 }
 0x12c   : > { %v979_v43 = vadd.f32 %v978_v42, %v860_v10  ;;  %v1066_v46 = vadd.f32 %v1065_v52, %v965_v12 }
 0x12d   : > { %v980_v27 = vpop.f32.mrf.mxu0  ;;  %v1067_v28 = vpop.f32.mrf.mxu1 }
 0x12e   : > { %v3536_v1 = vmul.f32 -1.442695, %v1066_v46  ;;  %v981_v39 = vadd.f32 %v980_v27, %v862_v23  ;;  %v1068_v20 = vadd.f32 %v1067_v28, %v967_v47 }
 0x12f   : > { %v985_v36 = vpop.f32.mrf.mxu0  ;;  %v1072_v34 = vpop.f32.mrf.mxu1 }
 0x130   : > { %3616 = vpow2.f32 %v3536_v1  ;;  %v3537_v25 = vmul.f32 -1.442695, %v1068_v20  ;;  %v986_v19 = vadd.f32 %v985_v36, %v869_v48  ;;  %v1073_v18 = vadd.f32 %v1072_v34, %v972_v49 }
 0x131   : > { %v987_v59 = vpop.f32.mrf.mxu0  ;;  %v1074_v51 = vpop.f32.mrf.mxu1 }
 0x132   : > { %3618 = vpow2.f32 %v3537_v25  ;;  %v3540_v2 = vmul.f32 -1.442695, %v1073_v18  ;;  %v988_v41 = vadd.f32 %v987_v59, %v871_v62  ;;  %v1075_v11 = vadd.f32 %v1074_v51, %v974_v5 }
 0x133   : > { %v1079_v53 = vpop.f32.mrf.mxu1  ;;  %v1170_v0 = vpop.f32.mrf.mxu0 }
 0x134   : > { %3620 = vpow2.f32 %v3540_v2  ;;  %v3541_v3 = vmul.f32 -1.442695, %v1075_v11  ;;  %v1080_v57 = vadd.f32 %v1079_v53, %v979_v43  ;;  %v1171_v17 = vadd.f32 %v1170_v0, %v4729_v9 }
 0x135   : > { %v1081_v6 = vpop.f32.mrf.mxu1  ;;  %v1172_v7 = vpop.f32.mrf.mxu0 }
 0x136   : > { %3622 = vpow2.f32 %v3541_v3  ;;  %v1082_v16 = vadd.f32 %v1081_v6, %v981_v39  ;;  %v3544_v55 = vmul.f32 -1.442695, %v1080_v57  ;;  %v1173_v58 = vadd.f32 %v1172_v7, %v4729_v9 }
 0x137   : > { %v1086_v50 = vpop.f32.mrf.mxu1  ;;  %v1181_v61 = vpop.f32.mrf.mxu0 }
 0x138   : > { %v1087_v21 = vadd.f32 %v1086_v50, %v986_v19  ;;  %v1182_v44 = vadd.f32 %v1181_v61, %v4734_v40  ;;  %3624 = vpow2.f32 %v3544_v55  ;;  %v3545_v38 = vmul.f32 -1.442695, %v1082_v16  ;;  %v1857_v55 = vld [vmem:[%s4760_s15] sm:$0xff] }
 0x139   : > { %v1088_v26 = vpop.f32.mrf.mxu1  ;;  %v1183_v35 = vpop.f32.mrf.mxu0 }
 0x13a   : > { %v1089_v4 = vadd.f32 %v1088_v26, %v988_v41  ;;  %3626 = vtanh.f32 %v1087_v21  ;;  %v1184_v10 = vadd.f32 %v1183_v35, %v4734_v40 }
 0x13b   : > { %v1192_v8 = vpop.f32.mrf.mxu0  ;;  %v1315_v14 = vpop.f32.mrf.mxu1 }
 0x13c   : > { %v1316_v22 = vadd.f32 %v1315_v14, %v1171_v17  ;;  %v1193_v23 = vadd.f32 %v1192_v8, %v4736_v54 }
 0x13d   : > { %v3617_v29 = vpop.eup %3616  ;;  %v1194_v30 = vpop.f32.mrf.mxu0 }
 0x13e   : > { %v1317_v31 = vpop.f32.mrf.mxu1  ;;  %v1817_v32 = vadd.f32 1.0, %v3617_v29  ;;  %v1195_v62 = vadd.f32 %v1194_v30, %v4736_v54 }
 0x13f   : > { %v1318_v33 = vadd.f32 %v1317_v31, %v1173_v58  ;;  %v3619_v37 = vpop.eup %3618  ;;  %v1203_v12 = vpop.f32.mrf.mxu0  ;;  %v1858_v31 = vld [vmem:[%s4760_s15 + $0x8] sm:$0xff] }
 0x140   : > { %v1322_v63 = vpop.f32.mrf.mxu1  ;;  %3628 = vrcp.f32 %v1817_v32  ;;  %v1818_v15 = vadd.f32 1.0, %v3619_v37  ;;  %v1204_v5 = vadd.f32 %v1203_v12, %v4742_v13 }
 0x141   : > { %v1323_v47 = vadd.f32 %v1322_v63, %v1182_v44  ;;  %v3621_v24 = vpop.eup %3620  ;;  %3630 = vtanh.f32 %v1089_v4  ;;  %v1205_v45 = vpop.f32.mrf.mxu0 }
 0x142   : > { %v1324_v48 = vpop.f32.mrf.mxu1  ;;  %3632 = vrcp.f32 %v1818_v15  ;;  %v1821_v49 = vadd.f32 1.0, %v3621_v24  ;;  %v1206_v25 = vadd.f32 %v1205_v45, %v4742_v13 }
 0x143   : > { %v1325_v60 = vadd.f32 %v1324_v48, %v1184_v10  ;;  %v3623_v56 = vpop.eup %3622  ;;  %3634 = vpow2.f32 %v3545_v38  ;;  %v1425_v52 = vpop.f32.mrf.mxu0 }
 0x144   : > { %v1329_v42 = vpop.f32.mrf.mxu1  ;;  %3636 = vrcp.f32 %v1821_v49  ;;  %v1822_v43 = vadd.f32 1.0, %v3623_v56  ;;  %v1426_v27 = vadd.f32 %v1425_v52, %v1316_v22 }
 0x145   : > { %v1330_v46 = vadd.f32 %v1329_v42, %v1193_v23  ;;  %v1427_v1 = vpop.f32.mrf.mxu0  ;;  %v3625_v11 = vpop.eup %3624 }
 0x146   : > { %v1331_v28 = vpop.f32.mrf.mxu1  ;;  %3638 = vrcp.f32 %v1822_v43  ;;  %v1428_v20 = vadd.f32 %v1427_v1, %v1318_v33  ;;  %v1825_v30 = vadd.f32 1.0, %v3625_v11 }
 0x147   : > { %v1332_v39 = vadd.f32 %v1331_v28, %v1195_v62  ;;  %v1433_v34 = vpop.f32.mrf.mxu0  ;;  %v3627_v3 = vpop.eup %3626 }
 0x148   : > { %v1336_v36 = vpop.f32.mrf.mxu1  ;;  %v1434_v18 = vadd.f32 %v1433_v34, %v1323_v47  ;;  %3640 = vrcp.f32 %v1825_v30 }
 0x149   : > { %v1337_v19 = vadd.f32 %v1336_v36, %v1204_v5  ;;  %v1435_v51 = vpop.f32.mrf.mxu0 }
 0x14a   : > { %v1338_v59 = vpop.f32.mrf.mxu1  ;;  %v1436_v41 = vadd.f32 %v1435_v51, %v1325_v60 }
 0x14b   : > { %v1339_v2 = vadd.f32 %v1338_v59, %v1206_v25  ;;  %v1441_v53 = vpop.f32.mrf.mxu0 }
 0x14c   : > { %v1531_v0 = vpop.f32.mrf.mxu1  ;;  %v1442_v57 = vadd.f32 %v1441_v53, %v1330_v46 }
 0x14d   : > { %v1532_v6 = vadd.f32 %v1531_v0, %v1426_v27  ;;  %v3629_v7 = vpop.eup %3628  ;;  %v1443_v16 = vpop.f32.mrf.mxu0 }
 0x14e   : > { %v1533_v50 = vpop.f32.mrf.mxu1  ;;  %v3631_v61 = vpop.eup %3630  ;;  %v1865_v17 = vmul.f32 %v3629_v7, %v3627_v3  ;;  %v1444_v21 = vadd.f32 %v1443_v16, %v1332_v39 }
 0x14f   : > { %v1534_v26 = vadd.f32 %v1533_v50, %v1428_v20  ;;  %v3633_v35 = vpop.eup %3632  ;;  %v1449_v4 = vpop.f32.mrf.mxu0 }
 0x150   : > { %v1540_v8 = vpop.f32.mrf.mxu1  ;;  %v3635_v14 = vpop.eup %3634  ;;  %v1866_v58 = vmul.f32 %v3633_v35, %v3631_v61  ;;  %v1450_v44 = vadd.f32 %v1449_v4, %v1337_v19 }
 0x151   : > { %v1541_v22 = vadd.f32 %v1540_v8, %v1434_v18  ;;  %v3637_v29 = vpop.eup %3636  ;;  %v1451_v32 = vpop.f32.mrf.mxu0  ;;  %v1826_v63 = vadd.f32 1.0, %v3635_v14 }
 0x152   : > { %v1542_v33 = vpop.f32.mrf.mxu1  ;;  %v1861_v37 = vmul.f32 %v3637_v29, %v1857_v55  ;;  %v1452_v38 = vadd.f32 %v1451_v32, %v1339_v2 }
 0x153   : > { %v1543_v10 = vadd.f32 %v1542_v33, %v1436_v41  ;;  %v3639_v12 = vpop.eup %3638  ;;  %v1654_v23 = vpop.f32.mrf.mxu0 }
 0x154   : > { %v1549_v15 = vpop.f32.mrf.mxu1  ;;  %v4764_v47 = vadd.f32 %v1865_v17, %v1861_v37  ;;  %v1862_v24 = vmul.f32 %v3639_v12, %v1858_v31  ;;  %v1655_v48 = vadd.f32 %v1654_v23, %v1532_v6 }
 0x155   : > { %v1550_v45 = vadd.f32 %v1549_v15, %v1442_v57  ;;  %v1656_v60 = vpop.f32.mrf.mxu0  ;;  %v3641_v7 = vpop.eup %3640 }
 0x156   : > { %v1551_v49 = vpop.f32.mrf.mxu1  ;;  %3642 = vtanh.f32 %v4764_v47  ;;  %v4767_v56 = vadd.f32 %v1866_v58, %v1862_v24  ;;  %v1657_v5 = vadd.f32 %v1656_v60, %v1534_v26 }
 0x157   : > { %v1552_v62 = vadd.f32 %v1551_v49, %v1444_v21  ;;  %3644 = vrcp.f32 %v1826_v63  ;;  %v1661_v52 = vpop.f32.mrf.mxu0 }
 0x158   : > { %v1558_v42 = vpop.f32.mrf.mxu1  ;;  %3646 = vtanh.f32 %v4767_v56  ;;  %v1662_v46 = vadd.f32 %v1661_v52, %v1541_v22 }
 0x159   : > { %v1559_v43 = vadd.f32 %v1558_v42, %v1450_v44  ;;  %v1663_v28 = vpop.f32.mrf.mxu0 }
 0x15a   : > { %v1560_v27 = vpop.f32.mrf.mxu1  ;;  %v1664_v39 = vadd.f32 %v1663_v28, %v1543_v10 }
 0x15b   : > { %v1561_v1 = vadd.f32 %v1560_v27, %v1452_v38  ;;  %v1668_v20 = vpop.f32.mrf.mxu0 }
 0x15c   : > { %v1755_v36 = vpop.f32.mrf.mxu1  ;;  %v1669_v34 = vadd.f32 %v1668_v20, %v1550_v45 }
 0x15d   : > { %v1756_v25 = vadd.f32 %v1755_v36, %v1655_v48  ;;  %v1670_v19 = vpop.f32.mrf.mxu0 }
 0x15e   : > { %v1757_v18 = vpop.f32.mrf.mxu1  ;;  %v1671_v51 = vadd.f32 %v1670_v19, %v1552_v62 }
 0x15f   : > { %v3538_v59 = vmul.f32 -1.442695, %v1756_v25  ;;  %v1758_v2 = vadd.f32 %v1757_v18, %v1657_v5  ;;  %v1675_v41 = vpop.f32.mrf.mxu0 }
 0x160   : > { %v1762_v11 = vpop.f32.mrf.mxu1  ;;  %v1676_v0 = vadd.f32 %v1675_v41, %v1559_v43 }
 0x161   : > { %3648 = vpow2.f32 %v3538_v59  ;;  %v3539_v53 = vmul.f32 -1.442695, %v1758_v2  ;;  %v1763_v3 = vadd.f32 %v1762_v11, %v1662_v46  ;;  %v1677_v57 = vpop.f32.mrf.mxu0 }
 0x162   : > { %v1764_v6 = vpop.f32.mrf.mxu1  ;;  %v1678_v50 = vadd.f32 %v1677_v57, %v1561_v1 }
 0x163   : > { %3650 = vpow2.f32 %v3539_v53  ;;  %v3542_v16 = vmul.f32 -1.442695, %v1763_v3  ;;  %v1765_v61 = vadd.f32 %v1764_v6, %v1664_v39  ;;  %v3643_v17 = vpop.eup %3642  ;;  %v4770_v26 = vpop.f32.mrf.mxu0 }
 0x164   : > { %v1769_v21 = vpop.f32.mrf.mxu1  ;;  %v3645_v35 = vpop.eup %3644  ;;  %v4772_v55 = vmul.f32 %v3643_v17, %v3641_v7  ;;  %v1859_v7 = vld [vmem:[%s4760_s15 + $0x10] sm:$0xff]  ;;  %v1990_v17 = vadd.f32 %v4770_v26, %v4729_v9 }
 0x165   : > { %3652 = vpow2.f32 %v3542_v16  ;;  %v3543_v4 = vmul.f32 -1.442695, %v1765_v61  ;;  %v1770_v8 = vadd.f32 %v1769_v21, %v1669_v34  ;;  %v3647_v14 = vpop.eup %3646  ;;  %v4774_v44 = vpop.f32.mrf.mxu0 }
 0x166   : > { %v1771_v58 = vpop.f32.mrf.mxu1  ;;  %v4776_v22 = vmul.f32 %v3647_v14, %v3645_v35 }
 0x167   : > { %3654 = vpow2.f32 %v3543_v4  ;;  %v1772_v29 = vadd.f32 %v1771_v58, %v1671_v51  ;;  %v4778_v31 = vpop.f32.mrf.mxu0  ;;  %v3546_v38 = vmul.f32 -1.442695, %v1770_v8  ;;  %v1860_v8 = vld [vmem:[%s4760_s15 + $0x18] sm:$0xff] }
 0x168   : > { %v1776_v30 = vpop.f32.mrf.mxu1  ;;  %v2001_v26 = vadd.f32 %v4778_v31, %v4734_v40 }
 0x169   : > { %v1777_v32 = vadd.f32 %v1776_v30, %v1676_v0  ;;  %v4780_v37 = vpop.f32.mrf.mxu0  ;;  %3656 = vpow2.f32 %v3546_v38  ;;  %v3547_v49 = vmul.f32 -1.442695, %v1772_v29 }
 0x16a   : > { %v1778_v33 = vpop.f32.mrf.mxu1 }
 0x16b   : > { %v1779_v10 = vadd.f32 %v1778_v33, %v1678_v50  ;;  %v4782_v12 = vpop.f32.mrf.mxu0  ;;  %3658 = vtanh.f32 %v1777_v32  ;;  %v1992_v33 = vadd.f32 %v4774_v44, %v4729_v9  ;;  %v2003_v44 = vadd.f32 %v4780_v37, %v4734_v40 }
 0x16c   : > { %v2134_v63 = vpop.f32.mrf.mxu1  ;;  %v2012_v37 = vadd.f32 %v4782_v12, %v4736_v54 }
 0x16d   : > { %v4784_v23 = vpop.f32.mrf.mxu0 }
 0x16e   : > { %v3649_v15 = vpop.eup %3648  ;;  %v4786_v24 = vpop.f32.mrf.mxu1 }
 0x16f   : > { %v1819_v45 = vadd.f32 1.0, %v3649_v15  ;;  %v4788_v60 = vpop.f32.mrf.mxu0 }
 0x170   : > { %v3651_v48 = vpop.eup %3650  ;;  %v4790_v62 = vpop.f32.mrf.mxu1 }
 0x171   : > { %3660 = vrcp.f32 %v1819_v45  ;;  %v1820_v5 = vadd.f32 1.0, %v3651_v48  ;;  %v4792_v52 = vpop.f32.mrf.mxu0  ;;  %v2135_v48 = vadd.f32 %v2134_v63, %v1990_v17  ;;  %v2142_v31 = vadd.f32 %v4790_v62, %v2001_v26 }
 0x172   : > { %v3653_v42 = vpop.eup %3652  ;;  %3662 = vtanh.f32 %v1779_v10  ;;  %v4794_v43 = vpop.f32.mrf.mxu1  ;;  %v2014_v62 = vadd.f32 %v4784_v23, %v4736_v54 }
 0x173   : > { %3664 = vrcp.f32 %v1820_v5  ;;  %v1823_v46 = vadd.f32 1.0, %v3653_v42  ;;  %v2244_v1 = vpop.f32.mrf.mxu0 }
 0x174   : > { %v3655_v27 = vpop.eup %3654  ;;  %3666 = vpow2.f32 %v3547_v49  ;;  %v4796_v28 = vpop.f32.mrf.mxu1 }
 0x175   : > { %3668 = vrcp.f32 %v1823_v46  ;;  %v1824_v39 = vadd.f32 1.0, %v3655_v27  ;;  %v2246_v36 = vpop.f32.mrf.mxu0  ;;  %v2137_v46 = vadd.f32 %v4786_v24, %v1992_v33  ;;  %v2245_v27 = vadd.f32 %v2244_v1, %v2135_v48 }
 0x176   : > { %v4798_v20 = vpop.f32.mrf.mxu1  ;;  %v3657_v59 = vpop.eup %3656 }
 0x177   : > { %3670 = vrcp.f32 %v1824_v39  ;;  %v2252_v25 = vpop.f32.mrf.mxu0  ;;  %v1827_v4 = vadd.f32 1.0, %v3657_v59  ;;  %v2247_v63 = vadd.f32 %v2246_v36, %v2137_v46 }
 0x178   : > { %v4800_v34 = vpop.f32.mrf.mxu1  ;;  %v3659_v41 = vpop.eup %3658  ;;  %v2253_v24 = vadd.f32 %v2252_v25, %v2142_v31 }
 0x179   : > { %v2254_v18 = vpop.f32.mrf.mxu0  ;;  %3672 = vrcp.f32 %v1827_v4 }
 0x17a   : > { %v4802_v19 = vpop.f32.mrf.mxu1 }
 0x17b   : > { %v4804_v51 = vpop.f32.mrf.mxu0 }
 0x17c   : > { %v2350_v2 = vpop.f32.mrf.mxu1 }
 0x17d   : > { %v4806_v53 = vpop.f32.mrf.mxu0 }
 0x17e   : > { %v3661_v11 = vpop.eup %3660  ;;  %v2352_v0 = vpop.f32.mrf.mxu1 }
 0x17f   : > { %v3663_v3 = vpop.eup %3662  ;;  %v1867_v57 = vmul.f32 %v3661_v11, %v3659_v41  ;;  %v4809_v16 = vpop.f32.mrf.mxu0  ;;  %v2351_v41 = vadd.f32 %v2350_v2, %v2245_v27  ;;  %v2353_v1 = vadd.f32 %v2352_v0, %v2247_v63  ;;  %v2149_v0 = vadd.f32 %v4796_v28, %v2012_v37 }
 0x180   : > { %v3665_v6 = vpop.eup %3664  ;;  %v2359_v50 = vpop.f32.mrf.mxu1 }
 0x181   : > { %v3667_v61 = vpop.eup %3666  ;;  %v1868_v21 = vmul.f32 %v3665_v6, %v3663_v3  ;;  %v4814_v14 = vpop.f32.mrf.mxu0  ;;  %v2261_v23 = vadd.f32 %v4804_v51, %v2149_v0 }
 0x182   : > { %v3669_v35 = vpop.eup %3668  ;;  %v2361_v58 = vpop.f32.mrf.mxu1  ;;  %v1828_v32 = vadd.f32 1.0, %v3667_v61 }
 0x183   : > { %v1863_v29 = vmul.f32 %v3669_v35, %v1859_v7  ;;  %v2473_v10 = vpop.f32.mrf.mxu0 }
 0x184   : > { %v3671_v30 = vpop.eup %3670  ;;  %v2368_v38 = vpop.f32.mrf.mxu1  ;;  %v2474_v6 = vadd.f32 %v2473_v10, %v2351_v41  ;;  %v2023_v10 = vadd.f32 %v4788_v60, %v4742_v13 }
 0x185   : > { %v4818_v15 = vadd.f32 %v1867_v57, %v1863_v29  ;;  %v1864_v45 = vmul.f32 %v3671_v30, %v1860_v8  ;;  %v2475_v5 = vpop.f32.mrf.mxu0  ;;  %v2144_v57 = vadd.f32 %v4794_v43, %v2003_v44  ;;  %v2151_v30 = vadd.f32 %v4798_v20, %v2014_v62 }
 0x186   : > { %v2370_v49 = vpop.f32.mrf.mxu1  ;;  %v2476_v35 = vadd.f32 %v2475_v5, %v2353_v1  ;;  %v2369_v46 = vadd.f32 %v2368_v38, %v2261_v23  ;;  %v2156_v41 = vadd.f32 %v4800_v34, %v2023_v10  ;;  %v2025_v38 = vadd.f32 %v4792_v52, %v4742_v13 }
 0x187   : > { %3674 = vtanh.f32 %v4818_v15  ;;  %v4823_v42 = vadd.f32 %v1868_v21, %v1864_v45  ;;  %v2480_v59 = vpop.f32.mrf.mxu0  ;;  %v2255_v17 = vadd.f32 %v2254_v18, %v2144_v57  ;;  %v2360_v21 = vadd.f32 %v2359_v50, %v2253_v24  ;;  %v3673_v45 = vpop.eup %3672 }
 0x188   : > { %3676 = vrcp.f32 %v1828_v32  ;;  %v4828_v39 = vpop.f32.mrf.mxu1  ;;  %v2263_v48 = vadd.f32 %v4806_v53, %v2151_v30  ;;  %v2158_v34 = vadd.f32 %v4802_v19, %v2025_v38  ;;  %v3576_v38 = vld [vmem:[%s4760_s15 + $0x20] sm:$0xff] }
 0x189   : > { %3678 = vtanh.f32 %v4823_v42  ;;  %v2482_v3 = vpop.f32.mrf.mxu0  ;;  %v2362_v8 = vadd.f32 %v2361_v58, %v2255_v17  ;;  %v2481_v29 = vadd.f32 %v2480_v59, %v2360_v21 }
 0x18a   : > { %v4832_v11 = vpop.f32.mrf.mxu1  ;;  %v2371_v63 = vadd.f32 %v2370_v49, %v2263_v48 }
 0x18b   : > { %v2487_v7 = vpop.f32.mrf.mxu0  ;;  %v2483_v33 = vadd.f32 %v2482_v3, %v2362_v8 }
 0x18c   : > { %v2574_v61 = vpop.f32.mrf.mxu1  ;;  %v2488_v3 = vadd.f32 %v2487_v7, %v2369_v46 }
 0x18d   : > { %v2575_v4 = vadd.f32 %v2574_v61, %v2474_v6  ;;  %v2489_v36 = vpop.f32.mrf.mxu0  ;;  %v2269_v6 = vadd.f32 %v4809_v16, %v2156_v41 }
 0x18e   : > { %v2576_v2 = vpop.f32.mrf.mxu1  ;;  %v2490_v1 = vadd.f32 %v2489_v36, %v2371_v63 }
 0x18f   : > { %v3564_v43 = vmul.f32 -1.442695, %v2575_v4  ;;  %v2577_v25 = vadd.f32 %v2576_v2, %v2476_v35  ;;  %v2494_v12 = vpop.f32.mrf.mxu0  ;;  %v2378_v7 = vadd.f32 %v4828_v39, %v2269_v6  ;;  %v2271_v4 = vadd.f32 %v4814_v14, %v2158_v34 }
 0x190   : > { %v2581_v32 = vpop.f32.mrf.mxu1 }
 0x191   : > { %3680 = vpow2.f32 %v3564_v43  ;;  %v3565_v18 = vmul.f32 -1.442695, %v2577_v25  ;;  %v2582_v50 = vadd.f32 %v2581_v32, %v2481_v29  ;;  %v2496_v26 = vpop.f32.mrf.mxu0  ;;  %v2495_v62 = vadd.f32 %v2494_v12, %v2378_v7 }
 0x192   : > { %v2583_v58 = vpop.f32.mrf.mxu1  ;;  %v2380_v29 = vadd.f32 %v4832_v11, %v2271_v4 }
 0x193   : > { %3682 = vpow2.f32 %v3565_v18  ;;  %v3568_v28 = vmul.f32 -1.442695, %v2582_v50  ;;  %v2584_v5 = vadd.f32 %v2583_v58, %v2483_v33  ;;  %v4845_v44 = vpop.f32.mrf.mxu0 }
 0x194   : > { %v3675_v20 = vpop.eup %3674  ;;  %v2588_v27 = vpop.f32.mrf.mxu1  ;;  %v2497_v30 = vadd.f32 %v2496_v26, %v2380_v29 }
 0x195   : > { %v3677_v59 = vpop.eup %3676  ;;  %v4847_v31 = vmul.f32 %v3675_v20, %v3673_v45  ;;  %3684 = vpow2.f32 %v3568_v28  ;;  %v3569_v60 = vmul.f32 -1.442695, %v2584_v5  ;;  %v4850_v53 = vpop.f32.mrf.mxu0  ;;  %v2589_v37 = vadd.f32 %v2588_v27, %v2488_v3 }
 0x196   : > { %v3679_v51 = vpop.eup %3678  ;;  %v2590_v57 = vpop.f32.mrf.mxu1 }
 0x197   : > { %v4852_v24 = vmul.f32 %v3679_v51, %v3677_v59  ;;  %3686 = vpow2.f32 %v3569_v60  ;;  %v4857_v61 = vpop.f32.mrf.mxu0  ;;  %v2591_v17 = vadd.f32 %v2590_v57, %v2490_v1  ;;  %v3572_v36 = vmul.f32 -1.442695, %v2589_v37 }
 0x198   : > { %v2595_v49 = vpop.f32.mrf.mxu1 }
 0x199   : > { %v4861_v35 = vpop.f32.mrf.mxu0  ;;  %v3573_v16 = vmul.f32 -1.442695, %v2591_v17  ;;  %v2596_v43 = vadd.f32 %v2595_v49, %v2495_v62  ;;  %3688 = vpow2.f32 %v3572_v36  ;;  %v2680_v17 = vadd.f32 %v4845_v44, %v4729_v9 }
 0x19a   : > { %v2597_v21 = vpop.f32.mrf.mxu1 }
 0x19b   : > { %v4864_v2 = vpop.f32.mrf.mxu0  ;;  %3690 = vpow2.f32 %v3573_v16  ;;  %v2598_v18 = vadd.f32 %v2597_v21, %v2497_v30  ;;  %v3577_v21 = vld [vmem:[%s4760_s15 + $0x28] sm:$0xff] }
 0x19c   : > { %v4866_v52 = vpop.f32.mrf.mxu1  ;;  %3692 = vtanh.f32 %v2596_v43 }
 0x19d   : > { %v4869_v25 = vpop.f32.mrf.mxu0 }
 0x19e   : > { %v3681_v8 = vpop.eup %3680  ;;  %v2826_v19 = vpop.f32.mrf.mxu1 }
 0x19f   : > { %v3326_v39 = vadd.f32 1.0, %v3681_v8  ;;  %v4871_v32 = vpop.f32.mrf.mxu0 }
 0x1a0   : > { %v3683_v0 = vpop.eup %3682  ;;  %v4873_v14 = vpop.f32.mrf.mxu1 }
 0x1a1   : > { %v3327_v12 = vadd.f32 1.0, %v3683_v0  ;;  %v4875_v50 = vpop.f32.mrf.mxu0  ;;  %3694 = vrcp.f32 %v3326_v39  ;;  %v2682_v39 = vadd.f32 %v4850_v53, %v4729_v9  ;;  %v2691_v0 = vadd.f32 %v4857_v61, %v4734_v40 }
 0x1a2   : > { %v3685_v33 = vpop.eup %3684  ;;  %v4877_v11 = vpop.f32.mrf.mxu1  ;;  %v2693_v53 = vadd.f32 %v4861_v35, %v4734_v40 }
 0x1a3   : > { %v3330_v10 = vadd.f32 1.0, %v3685_v33  ;;  %3696 = vrcp.f32 %v3327_v12  ;;  %v2934_v26 = vpop.f32.mrf.mxu0  ;;  %v2832_v61 = vadd.f32 %v4873_v14, %v2691_v0 }
 0x1a4   : > { %v3687_v23 = vpop.eup %3686  ;;  %v4879_v58 = vpop.f32.mrf.mxu1  ;;  %v2834_v40 = vadd.f32 %v4877_v11, %v2693_v53  ;;  %v2704_v11 = vadd.f32 %v4869_v25, %v4736_v54 }
 0x1a5   : > { %3698 = vrcp.f32 %v3330_v10  ;;  %v3331_v45 = vadd.f32 1.0, %v3687_v23  ;;  %v2936_v28 = vpop.f32.mrf.mxu0  ;;  %v2825_v10 = vadd.f32 %v4866_v52, %v2680_v17  ;;  %v2827_v23 = vadd.f32 %v2826_v19, %v2682_v39 }
 0x1a6   : > { %3700 = vtanh.f32 %v2598_v18  ;;  %v4881_v48 = vpop.f32.mrf.mxu1  ;;  %v3689_v60 = vpop.eup %3688  ;;  %v2702_v17 = vadd.f32 %v4864_v2, %v4736_v54 }
 0x1a7   : > { %3702 = vrcp.f32 %v3331_v45  ;;  %v2942_v20 = vpop.f32.mrf.mxu0  ;;  %v3334_v7 = vadd.f32 1.0, %v3689_v60  ;;  %v2935_v9 = vadd.f32 %v2934_v26, %v2825_v10 }
 0x1a8   : > { %v4883_v5 = vpop.f32.mrf.mxu1  ;;  %v3691_v51 = vpop.eup %3690  ;;  %v2943_v35 = vadd.f32 %v2942_v20, %v2832_v61  ;;  %v2713_v20 = vadd.f32 %v4871_v32, %v4742_v13 }
 0x1a9   : > { %v2944_v27 = vpop.f32.mrf.mxu0  ;;  %v3693_v57 = vpop.eup %3692  ;;  %v3335_v43 = vadd.f32 1.0, %v3691_v51  ;;  %3704 = vrcp.f32 %v3334_v7 }
 0x1aa   : > { %v4885_v46 = vpop.f32.mrf.mxu1 }
 0x1ab   : > { %v4887_v59 = vpop.f32.mrf.mxu0 }
 0x1ac   : > { %v3040_v63 = vpop.f32.mrf.mxu1 }
 0x1ad   : > { %v4889_v41 = vpop.f32.mrf.mxu0  ;;  %v3041_v19 = vadd.f32 %v3040_v63, %v2935_v9 }
 0x1ae   : > { %v3042_v3 = vpop.f32.mrf.mxu1  ;;  %v3695_v1 = vpop.eup %3694 }
 0x1af   : > { %v4892_v6 = vpop.f32.mrf.mxu0  ;;  %v3375_v8 = vmul.f32 %v3695_v1, %v3693_v57 }
 0x1b0   : > { %v3049_v37 = vpop.f32.mrf.mxu1  ;;  %v3697_v49 = vpop.eup %3696 }
 0x1b1   : > { %v4897_v4 = vpop.f32.mrf.mxu0 }
 0x1b2   : > { %v3699_v34 = vpop.eup %3698  ;;  %v3051_v62 = vpop.f32.mrf.mxu1 }
 0x1b3   : > { %v3701_v36 = vpop.eup %3700  ;;  %v3371_v16 = vmul.f32 %v3699_v34, %v3576_v38  ;;  %v3163_v12 = vpop.f32.mrf.mxu0 }
 0x1b4   : > { %v3703_v29 = vpop.eup %3702  ;;  %v3058_v30 = vpop.f32.mrf.mxu1  ;;  %v3376_v18 = vmul.f32 %v3701_v36, %v3697_v49  ;;  %v3164_v49 = vadd.f32 %v3163_v12, %v3041_v19  ;;  %v3050_v36 = vadd.f32 %v3049_v37, %v2943_v35  ;;  %v2841_v12 = vadd.f32 %v4881_v48, %v2704_v11 }
 0x1b5   : > { %v3379_v44 = vadd.f32 %v3375_v8, %v3371_v16  ;;  %v3372_v33 = vmul.f32 %v3703_v29, %v3577_v21  ;;  %v3165_v60 = vpop.f32.mrf.mxu0  ;;  %v2945_v21 = vadd.f32 %v2944_v27, %v2834_v40 }
 0x1b6   : > { %v3060_v45 = vpop.f32.mrf.mxu1  ;;  %v2953_v32 = vadd.f32 %v4889_v41, %v2841_v12 }
 0x1b7   : > { %3706 = vtanh.f32 %v3379_v44  ;;  %v3395_v51 = vadd.f32 %v3379_v44, %v4764_v47  ;;  %v3380_v57 = vadd.f32 %v3376_v18, %v3372_v33  ;;  %v3170_v38 = vpop.f32.mrf.mxu0  ;;  %v2937_v47 = vadd.f32 %v2936_v28, %v2827_v23  ;;  %v3705_v33 = vpop.eup %3704 }
 0x1b8   : > { %3708 = vrcp.f32 %v3335_v43  ;;  %v4908_v1 = vpop.f32.mrf.mxu1  ;;  %v3052_v28 = vadd.f32 %v3051_v62, %v2945_v21  ;;  %v3171_v63 = vadd.f32 %v3170_v38, %v3050_v36 }
 0x1b9   : > { %3403 = vst [vmem:[%s4911_s13 + $0x20] sm:$0xff] %v3395_v51  ;;  %3710 = vtanh.f32 %v3380_v57  ;;  %v3396_v52 = vadd.f32 %v3380_v57, %v4767_v56  ;;  %v3043_v14 = vadd.f32 %v3042_v3, %v2937_v47  ;;  %v3172_v34 = vpop.f32.mrf.mxu0  ;;  %v2839_v3 = vadd.f32 %v4879_v58, %v2702_v17 }
 0x1ba   : > { %v4915_v26 = vpop.f32.mrf.mxu1  ;;  %v3173_v0 = vadd.f32 %v3172_v34, %v3052_v28  ;;  %v2846_v57 = vadd.f32 %v4883_v5, %v2713_v20  ;;  %v3578_v20 = vld [vmem:[%s4760_s15 + $0x30] sm:$0xff] }
 0x1bb   : > { %3404 = vst [vmem:[%s4911_s13 + $0x28] sm:$0xff] %v3396_v52  ;;  %v3166_v16 = vadd.f32 %v3165_v60, %v3043_v14  ;;  %v3177_v2 = vpop.f32.mrf.mxu0  ;;  %v2951_v62 = vadd.f32 %v4887_v59, %v2839_v3  ;;  %v3061_v59 = vadd.f32 %v3060_v45, %v2953_v32 }
 0x1bc   : > { %v3264_v7 = vpop.f32.mrf.mxu1  ;;  %v2959_v41 = vadd.f32 %v4892_v6, %v2846_v57 }
 0x1bd   : > { %v3265_v8 = vadd.f32 %v3264_v7, %v3164_v49  ;;  %v3059_v10 = vadd.f32 %v3058_v30, %v2951_v62  ;;  %v3179_v58 = vpop.f32.mrf.mxu0  ;;  %v2715_v30 = vadd.f32 %v4875_v50, %v4742_v13 }
 0x1be   : > { %v3266_v56 = vpop.f32.mrf.mxu1  ;;  %v3180_v47 = vadd.f32 %v3179_v58, %v3061_v59  ;;  %v3068_v45 = vadd.f32 %v4908_v1, %v2959_v41 }
 0x1bf   : > { %v3566_v29 = vmul.f32 -1.442695, %v3265_v8  ;;  %v3267_v43 = vadd.f32 %v3266_v56, %v3166_v16  ;;  %v3178_v53 = vadd.f32 %v3177_v2, %v3059_v10  ;;  %v3184_v19 = vpop.f32.mrf.mxu0  ;;  %v2848_v35 = vadd.f32 %v4885_v46, %v2715_v30 }
 0x1c0   : > { %v3271_v39 = vpop.f32.mrf.mxu1 }
 0x1c1   : > { %3712 = vpow2.f32 %v3566_v29  ;;  %v3567_v27 = vmul.f32 -1.442695, %v3267_v43  ;;  %v3272_v37 = vadd.f32 %v3271_v39, %v3171_v63  ;;  %v2961_v6 = vadd.f32 %v4897_v4, %v2848_v35  ;;  %v3186_v34 = vpop.f32.mrf.mxu0 }
 0x1c2   : > { %v3273_v44 = vpop.f32.mrf.mxu1 }
 0x1c3   : > { %3714 = vpow2.f32 %v3567_v27  ;;  %v3570_v18 = vmul.f32 -1.442695, %v3272_v37  ;;  %v3274_v54 = vadd.f32 %v3273_v44, %v3173_v0  ;;  %v3070_v50 = vadd.f32 %v4915_v26, %v2961_v6  ;;  %v3579_v0 = vld [vmem:[%s4760_s15 + $0x38] sm:$0xff] }
 0x1c4   : > { %v3707_v25 = vpop.eup %3706  ;;  %v3278_v23 = vpop.f32.mrf.mxu1 }
 0x1c5   : > { %v3709_v60 = vpop.eup %3708  ;;  %v3387_v51 = vmul.f32 %v3707_v25, %v3705_v33  ;;  %3716 = vpow2.f32 %v3570_v18  ;;  %v3571_v48 = vmul.f32 -1.442695, %v3274_v54  ;;  %v3279_v40 = vadd.f32 %v3278_v23, %v3178_v53  ;;  %v3437_v53 = vld [vmem:[%s4911_s13 + $0x20] sm:$0xff] (%p3829_p5) }
 0x1c6   : > { %v3711_v9 = vpop.eup %3710  ;;  %v3280_v61 = vpop.f32.mrf.mxu1  ;;  %v3187_v8 = vadd.f32 %v3186_v34, %v3070_v50  ;;  %3438 = vst [vmem:[%s3416_s25 + $0x40] sm:$0xff] (%p3829_p5), %v3437_v53 }
 0x1c7   : > { %v3391_v38 = vadd.f32 %v3387_v51, %v4772_v55  ;;  %v3388_v52 = vmul.f32 %v3711_v9, %v3709_v60  ;;  %3718 = vpow2.f32 %v3571_v48  ;;  %v3281_v14 = vadd.f32 %v3280_v61, %v3180_v47  ;;  %v3439_v61 = vld [vmem:[%s4911_s13 + $0x28] sm:$0xff] (%p3829_p5) }
 0x1c8   : > { %v3285_v49 = vpop.f32.mrf.mxu1  ;;  %v3185_v55 = vadd.f32 %v3184_v19, %v3068_v45  ;;  %v3574_v17 = vmul.f32 -1.442695, %v3279_v40  ;;  %3440 = vst [vmem:[%s3416_s25 + $0x48] sm:$0xff] (%p3829_p5), %v3439_v61 }
 0x1c9   : > { %3399 = vst [vmem:[%s4911_s13] sm:$0xff] %v3391_v38  ;;  %v3392_v5 = vadd.f32 %v3388_v52, %v4776_v22  ;;  %v3575_v21 = vmul.f32 -1.442695, %v3281_v14 }
 0x1ca   : > { %v3286_v7 = vadd.f32 %v3285_v49, %v3185_v55  ;;  %v3287_v16 = vpop.f32.mrf.mxu1  ;;  %3720 = vpow2.f32 %v3574_v17 }
 0x1cb   : > { %3400 = vst [vmem:[%s4911_s13 + $0x8] sm:$0xff] %v3392_v5  ;;  %v3288_v56 = vadd.f32 %v3287_v16, %v3187_v8 }
 0x1cc   : > { %3722 = vtanh.f32 %v3286_v7 }
 0x1cd   : > { %3724 = vpow2.f32 %v3575_v21 }
 0x1ce   : > { %v3713_v13 = vpop.eup %3712 }
 0x1cf   : > { %v3328_v36 = vadd.f32 1.0, %v3713_v13 }
 0x1d0   : > { %v3715_v22 = vpop.eup %3714 }
 0x1d1   : > { %v3329_v1 = vadd.f32 1.0, %v3715_v22  ;;  %3726 = vrcp.f32 %v3328_v36 }
 0x1d2   : > { %v3717_v46 = vpop.eup %3716 }
 0x1d3   : > { %v3332_v4 = vadd.f32 1.0, %v3717_v46  ;;  %3728 = vrcp.f32 %v3329_v1 }
 0x1d4   : > { %v3719_v28 = vpop.eup %3718 }
 0x1d5   : > { %3730 = vrcp.f32 %v3332_v4  ;;  %v3333_v63 = vadd.f32 1.0, %v3719_v28 }
 0x1d6   : > { %3732 = vtanh.f32 %v3288_v56 }
 0x1d7   : > { %3734 = vrcp.f32 %v3333_v63  ;;  %v3721_v26 = vpop.eup %3720 }
 0x1d8   : > { %v3336_v39 = vadd.f32 1.0, %v3721_v26 }
 0x1d9   : > { %v3723_v29 = vpop.eup %3722 }
 0x1da   : > { %v3725_v43 = vpop.eup %3724  ;;  %3736 = vrcp.f32 %v3336_v39 }
 0x1db   : > { %v3337_v44 = vadd.f32 1.0, %v3725_v43 }
 0x1de   : > { %v3727_v11 = vpop.eup %3726 }
 0x1df   : > { %v3377_v12 = vmul.f32 %v3727_v11, %v3723_v29 }
 0x1e0   : > { %v3729_v3 = vpop.eup %3728 }
 0x1e2   : > { %v3731_v2 = vpop.eup %3730 }
 0x1e3   : > { %v3733_v27 = vpop.eup %3732  ;;  %v3373_v37 = vmul.f32 %v3731_v2, %v3578_v20 }
 0x1e4   : > { %v3735_v62 = vpop.eup %3734  ;;  %v3378_v54 = vmul.f32 %v3733_v27, %v3729_v3 }
 0x1e5   : > { %v3381_v33 = vadd.f32 %v3377_v12, %v3373_v37  ;;  %v3374_v18 = vmul.f32 %v3735_v62, %v3579_v0 }
 0x1e7   : > { %3738 = vtanh.f32 %v3381_v33  ;;  %v3397_v25 = vadd.f32 %v3381_v33, %v4818_v15  ;;  %v3382_v32 = vadd.f32 %v3378_v54, %v3374_v18  ;;  %v3737_v58 = vpop.eup %3736  ;;  %v3429_v15 = vld [vmem:[%s4911_s13] sm:$0xff] (%p3829_p5) }
 0x1e8   : > { %3740 = vrcp.f32 %v3337_v44  ;;  %3430 = vst [vmem:[%s3416_s25] sm:$0xff] (%p3829_p5), %v3429_v15 }
 0x1e9   : > { %3405 = vst [vmem:[%s4911_s13 + $0x30] sm:$0xff] %v3397_v25  ;;  %3742 = vtanh.f32 %v3382_v32  ;;  %v3398_v10 = vadd.f32 %v3382_v32, %v4823_v42  ;;  %v3431_v42 = vld [vmem:[%s4911_s13 + $0x8] sm:$0xff] (%p3829_p5) }
 0x1ea   : > { %3432 = vst [vmem:[%s3416_s25 + $0x8] sm:$0xff] (%p3829_p5), %v3431_v42 }
 0x1eb   : > { %3406 = vst [vmem:[%s4911_s13 + $0x38] sm:$0xff] %v3398_v10 }
 0x1f0   : > { %v3441_v38 = vld [vmem:[%s4911_s13 + $0x30] sm:$0xff] (%p3829_p5) }
 0x1f1   : > { %3442 = vst [vmem:[%s3416_s25 + $0x50] sm:$0xff] (%p3829_p5), %v3441_v38 }
 0x1f2   : > { %v3443_v52 = vld [vmem:[%s4911_s13 + $0x38] sm:$0xff] (%p3829_p5) }
 0x1f3   : > { %3444 = vst [vmem:[%s3416_s25 + $0x58] sm:$0xff] (%p3829_p5), %v3443_v52 }
 0x1f4   : > { %v3739_v23 = vpop.eup %3738 }
 0x1f5   : > { %v3741_v60 = vpop.eup %3740  ;;  %v3389_v51 = vmul.f32 %v3739_v23, %v3737_v58 }
 0x1f6   : > { %v3743_v57 = vpop.eup %3742 }
 0x1f7   : > { %v3393_v48 = vadd.f32 %v3389_v51, %v4847_v31  ;;  %v3390_v9 = vmul.f32 %v3743_v57, %v3741_v60  ;;  %3413 = sbr.rel (!%p3829_p5) target bundleno = 516 (0x204), region = 86 }
 0x1f9   : > { %3401 = vst [vmem:[%s4911_s13 + $0x10] sm:$0xff] %v3393_v48  ;;  %v3394_v59 = vadd.f32 %v3390_v9, %v4852_v24 }
 0x1fb   : > { %3402 = vst [vmem:[%s4911_s13 + $0x18] sm:$0xff] %v3394_v59 }
 0x200   : > { %v3433_v31 = vld [vmem:[%s4911_s13 + $0x10] sm:$0xff] }
 0x201   : > { %3434 = vst [vmem:[%s3416_s25 + $0x10] sm:$0xff] %v3433_v31 }
 0x202   : > { %v3435_v24 = vld [vmem:[%s4911_s13 + $0x18] sm:$0xff] }
 0x203   : > { %3436 = vst [vmem:[%s3416_s25 + $0x18] sm:$0xff] %v3435_v24 }
 0x204 PF: > { %p11_p10 = scmp.ge.s32.totalorder %s3812_s19, 4   ;;  %s4983_s15 = smov %s3762_s16 }
 0x205   : > { %s4984_s16 = smov %s3823_s22  ;;  %s4985_s17 = smov %s3812_s19 }
 0x206   :  { %13 = sbr.rel (!%p11_p10) target bundleno = 2 (0x2), region = 150 }

</bundles_post_ra>
